<compile_context>
chip_gen: v7x
topology: tpu7x:2x2x1
jax: 0.10.0
libtpu: 0.0.40
codegen_flags: <defaults>
</compile_context>

<pallas_src>
import functools

import jax
import jax.numpy as jnp
from jax.experimental import pallas as pl
from jax.experimental.pallas import tpu as pltpu


# ---------------------------------------------------------------------------
# helpers
# ---------------------------------------------------------------------------
def _head_block_mask(C, nhead, dtype=jnp.float32):
    """[C, C] indicator: mask[i, j] == 1 iff channels i and j belong to the same head."""
    D = C // nhead
    idx = jnp.arange(C)
    return (idx[:, None] // D == idx[None, :] // D).astype(dtype)


def _pick_tile(n, cap):
    """Largest tile <= cap dividing n; prefer multiples of 16 (bf16 sublane packing)."""
    if n <= cap:
        return n
    for t in range(cap - cap % 16, 15, -16):
        if n % t == 0:
            return t
    for t in range(cap - cap % 8, 7, -8):
        if n % t == 0:
            return t
    # TODO(synk): pad awkward L/S to a friendly multiple instead of a full-length block.
    return n


_VMEM_LIMIT = 48 * 1024 * 1024   # explicit: above v5e's 16 MiB default, below v7x physical


# ---------------------------------------------------------------------------
# One LoFTREncoderLayer forward
# ---------------------------------------------------------------------------
def loftr_encoder_layer(x, source, params, nhead):
    """x: [N, L, C] bf16, source: [N, S, C] bf16 -> [N, L, C] bf16."""
    N, L, C = x.shape
    S = source.shape[1]
    TS = _pick_tile(S, cap=512)
    TL = _pick_tile(L, cap=1024)
    num_s_tiles = S // TS
    # Split the S reduction two ways so both TensorCores of a 2-TC part (v7x) get work
    # even at N=1; partial KV/ksum are summed in f32 in the wrapper.
    P = 2 if (num_s_tiles % 2 == 0 and num_s_tiles >= 2) else 1
    tiles_per_split = num_s_tiles // P

    inv_s = 1.0 / float(S)
    eps_attn = 1e-6 * inv_s      # attention normalizer is carried scaled by 1/S
    eps_ln = 1e-5
    f32 = jnp.float32
    bf16 = jnp.bfloat16

    def const(shape):            # weight blocks: constant index map, any grid arity
        return pl.BlockSpec(shape, lambda *_: (0,) * len(shape))

    # ---------------- pass 1: KV = K^T V and ksum partials ----------------
    def kv_kernel(src_ref, wkv_ref, kv_ref, ks_ref, kv_acc, ks_acc):
        s = pl.program_id(2)

        @pl.when(s == 0)
        def _():
            kv_acc[...] = jnp.zeros_like(kv_acc)
            ks_acc[...] = jnp.zeros_like(ks_acc)

        src = src_ref[0]                                               # [TS, C] bf16
        kvp = jnp.dot(src, wkv_ref[...], preferred_element_type=f32)   # [TS, 2C] f32
        k = kvp[:, :C]
        v = kvp[:, C:]
        kf = jnp.where(k > 0, k + 1.0, jnp.exp(k))                     # elu(k) + 1

        # K^T @ V: contract dim 0 of both operands -> MXU, no explicit [TS,C] transpose.
        kv_acc[...] += jax.lax.dot_general(
            kf.astype(bf16), v.astype(bf16),
            dimension_numbers=(((0,), (0,)), ((), ())),
            preferred_element_type=f32)
        ks_acc[...] += jnp.sum(kf, axis=0, keepdims=True)              # [1, C]

        @pl.when(s == pl.num_programs(2) - 1)
        def _():
            kv_ref[0, 0] = kv_acc[...]
            ks_ref[0, 0] = ks_acc[...]

    kv_partial, ks_partial = pl.pallas_call(
        kv_kernel,
        out_shape=(jax.ShapeDtypeStruct((N, P, C, C), f32),
                   jax.ShapeDtypeStruct((N, P, 1, C), f32)),
        grid=(N, P, tiles_per_split),
        in_specs=[
            pl.BlockSpec((1, TS, C),
                         lambda b, p, s: (b, p * tiles_per_split + s, 0)),  # source
            const((C, 2 * C)),                                              # w_kv
        ],
        out_specs=(
            pl.BlockSpec((1, 1, C, C), lambda b, p, s: (b, p, 0, 0)),
            pl.BlockSpec((1, 1, 1, C), lambda b, p, s: (b, p, 0, 0)),
        ),
        scratch_shapes=[pltpu.VMEM((C, C), f32), pltpu.VMEM((1, C), f32)],
        compiler_params=pltpu.CompilerParams(
            dimension_semantics=("parallel", "parallel", "arbitrary"),
            vmem_limit_bytes=_VMEM_LIMIT),
    )(source, params["w_kv"])

    # ---------------- glue: fused attention RHS  [KV*mask | diag(ksum)@mask] / S ------
    kv = kv_partial.sum(axis=1)                        # [N, C, C]  f32
    ks = ks_partial.sum(axis=1)                        # [N, 1, C]  f32
    mask = _head_block_mask(C, nhead, f32)             # [C, C] (never a kernel input)
    ks_diag = jnp.swapaxes(ks, 1, 2) * mask            # [N,C,1]*[C,C] -> diag(ksum)@mask
    kv_rhs = (jnp.concatenate([kv * mask, ks_diag], axis=-1) * inv_s).astype(bf16)

    # ---------------- pass 2: attention apply + merge + LN + MLP + LN + residual ------
    def apply_kernel(x_ref, rhs_ref, wq3_ref, wm_ref, w1b_ref, w2_ref, ln_ref, o_ref):
        x_bf = x_ref[0]                                                # [TL, C] bf16

        # Fused q / mlp-top projection: one matmul over the same LHS (N = 3C lanes).
        q3 = jnp.dot(x_bf, wq3_ref[...], preferred_element_type=f32)   # [TL, 3C]
        q = q3[:, :C]
        h1_x = q3[:, C:]                                               # [TL, 2C]
        qf = jnp.where(q > 0, q + 1.0, jnp.exp(q))                     # elu(q) + 1

        # Numerator AND normalizer from one matmul against the fused pre-masked RHS.
        big = jnp.dot(qf.astype(bf16), rhs_ref[0],
                      preferred_element_type=f32)                      # [TL, 2C]
        num = big[:, :C]
        den = big[:, C:]
        z = pl.reciprocal(den + eps_attn, approx=False)                # EUP
        message = num * z                                              # 1/S scaling cancels

        msg = jnp.dot(message.astype(bf16), wm_ref[...],
                      preferred_element_type=f32)                      # merge

        ln = ln_ref[...]                                               # [4, C] f32

        def layernorm(t, g, b):
            mu = jnp.mean(t, axis=-1, keepdims=True)
            var = jnp.maximum(jnp.mean(t * t, axis=-1, keepdims=True) - mu * mu, 0.0)
            return (t - mu) * jax.lax.rsqrt(var + eps_ln) * g + b

        msg = layernorm(msg, ln[0:1], ln[1:2])

        # MLP over concat([x, msg]) without the concat (w1 row-split; the x-rows of w1
        # are fused into w_q3 above).
        h1 = jnp.maximum(
            h1_x + jnp.dot(msg.astype(bf16), w1b_ref[...], preferred_element_type=f32),
            0.0)
        h2 = jnp.dot(h1.astype(bf16), w2_ref[...], preferred_element_type=f32)
        h2 = layernorm(h2, ln[2:3], ln[3:4])

        o_ref[0] = (x_bf.astype(f32) + h2).astype(o_ref.dtype)

    out = pl.pallas_call(
        apply_kernel,
        out_shape=jax.ShapeDtypeStruct((N, L, C), bf16),
        grid=(N, L // TL),
        in_specs=[
            pl.BlockSpec((1, TL, C), lambda b, l: (b, l, 0)),          # x
            pl.BlockSpec((1, C, 2 * C), lambda b, l: (b, 0, 0)),       # fused RHS
            const((C, 3 * C)),                                         # w_q3 = [wq | w1_top]
            const((C, C)),                                             # wm (merge)
            const((C, 2 * C)),                                         # w1_bot
            const((2 * C, C)),                                         # w2
            const((4, C)),                                             # packed LN params
        ],
        out_specs=pl.BlockSpec((1, TL, C), lambda b, l: (b, l, 0)),
        compiler_params=pltpu.CompilerParams(
            dimension_semantics=("parallel", "parallel"),
            vmem_limit_bytes=_VMEM_LIMIT),
    )(x, kv_rhs, params["w_q3"], params["wm"], params["w1_bot"],
      params["w2"], params["ln"])
    return out


# ---------------------------------------------------------------------------
# LocalFeatureTransformer driver (block_type='loftr', attention='linear')
# ---------------------------------------------------------------------------
@functools.partial(jax.jit, static_argnames=("layer_names", "nhead"))
def local_feature_transformer(feat0, feat1, layer_params, layer_names, nhead):
    # 4-D NCHW inputs -> [N, L, C]   ('b c h w -> b (h w) c')
    if feat0.ndim == 4:
        B, C, H, W = feat0.shape
        feat0 = jnp.transpose(feat0, (0, 2, 3, 1)).reshape(B, H * W, C)
        feat1 = jnp.transpose(feat1, (0, 2, 3, 1)).reshape(B, H * W, C)
    f0 = feat0.astype(jnp.bfloat16)
    f1 = feat1.astype(jnp.bfloat16)
    for params, name in zip(layer_params, layer_names):
        if name == "self":
            f0 = loftr_encoder_layer(f0, f0, params, nhead)
            f1 = loftr_encoder_layer(f1, f1, params, nhead)
        elif name == "cross":
            f0 = loftr_encoder_layer(f0, f1, params, nhead)
            f1 = loftr_encoder_layer(f1, f0, params, nhead)
        else:
            raise KeyError(name)
    return f0.astype(jnp.float32), f1.astype(jnp.float32)


# ---------------------------------------------------------------------------
# Deterministic parameter init (xavier_uniform like _reset_parameters), pre-fused
# ---------------------------------------------------------------------------
def _xavier(key, fan_in, fan_out):
    bound = (6.0 / (fan_in + fan_out)) ** 0.5
    return jax.random.uniform(key, (fan_in, fan_out), jnp.float32, -bound, bound)


def init_layer_params(key, d_model):
    ks = jax.random.split(key, 6)
    C = d_model
    wq = _xavier(ks[0], C, C)
    wk = _xavier(ks[1], C, C)
    wv = _xavier(ks[2], C, C)
    wm = _xavier(ks[3], C, C)
    w1 = _xavier(ks[4], 2 * C, 2 * C)       # mlp[0]: init as one [2C,2C], split by rows
    w2 = _xavier(ks[5], 2 * C, C)           # mlp[2]
    return {
        "w_kv": jnp.concatenate([wk, wv], axis=1).astype(jnp.bfloat16),     # [C, 2C]
        "w_q3": jnp.concatenate([wq, w1[:C]], axis=1).astype(jnp.bfloat16),  # [C, 3C]
        "wm": wm.astype(jnp.bfloat16),                                       # [C, C]
        "w1_bot": w1[C:].astype(jnp.bfloat16),                               # [C, 2C]
        "w2": w2.astype(jnp.bfloat16),                                       # [2C, C]
        # packed LayerNorm params: rows = [gamma1, beta1, gamma2, beta2]
        "ln": jnp.concatenate([jnp.ones((1, C)), jnp.zeros((1, C)),
                               jnp.ones((1, C)), jnp.zeros((1, C))],
                              axis=0).astype(jnp.float32),                   # [4, C]
    }


# ---------------------------------------------------------------------------
# Pure-JAX mirror (same mixed precision) for a correctness check
# ---------------------------------------------------------------------------
def _bdot(a, b):
    return jnp.dot(a.astype(jnp.bfloat16), b.astype(jnp.bfloat16),
                   preferred_element_type=jnp.float32)


def _ln_ref(t, g, b, eps=1e-5):
    mu = t.mean(-1, keepdims=True)
    var = jnp.maximum((t * t).mean(-1, keepdims=True) - mu * mu, 0.0)
    return (t - mu) * jax.lax.rsqrt(var + eps) * g + b


def _fmap(t):
    return jnp.where(t > 0, t + 1.0, jnp.exp(t))


def _layer_ref(x, src, p, nhead):
    N, L, C = x.shape
    S = src.shape[1]
    mask = _head_block_mask(C, nhead, jnp.float32)

    kvp = _bdot(src, p["w_kv"])
    kf = _fmap(kvp[..., :C])
    v = kvp[..., C:]
    kv = jnp.einsum("nsi,nsj->nij", kf.astype(jnp.bfloat16), v.astype(jnp.bfloat16),
                    preferred_element_type=jnp.float32) * mask[None]
    ksum = kf.sum(axis=1, keepdims=True)                                  # [N, 1, C]
    ks_diag = jnp.swapaxes(ksum, 1, 2) * mask[None]                       # [N, C, C]
    rhs = (jnp.concatenate([kv, ks_diag], axis=-1) / S).astype(jnp.bfloat16)

    q3 = _bdot(x, p["w_q3"])
    qf = _fmap(q3[..., :C])
    h1_x = q3[..., C:]
    big = jnp.einsum("nlc,ncd->nld", qf.astype(jnp.bfloat16), rhs,
                     preferred_element_type=jnp.float32)
    message = big[..., :C] / (big[..., C:] + 1e-6 / S)

    ln = p["ln"]
    msg = _ln_ref(_bdot(message, p["wm"]), ln[0:1], ln[1:2])
    h1 = jnp.maximum(h1_x + _bdot(msg, p["w1_bot"]), 0.0)
    h2 = _ln_ref(_bdot(h1, p["w2"]), ln[2:3], ln[3:4])
    return (x.astype(jnp.float32) + h2).astype(jnp.bfloat16)


def _ref_forward(feat0, feat1, layer_params, layer_names, nhead):
    B, C, H, W = feat0.shape
    f0 = jnp.transpose(feat0, (0, 2, 3, 1)).reshape(B, H * W, C).astype(jnp.bfloat16)
    f1 = jnp.transpose(feat1, (0, 2, 3, 1)).reshape(B, H * W, C).astype(jnp.bfloat16)
    for p, name in zip(layer_params, layer_names):
        if name == "self":
            f0 = _layer_ref(f0, f0, p, nhead)
            f1 = _layer_ref(f1, f1, p, nhead)
        else:
            f0 = _layer_ref(f0, f1, p, nhead)
            f1 = _layer_ref(f1, f0, p, nhead)
    return f0.astype(jnp.float32), f1.astype(jnp.float32)


if __name__ == "__main__":
    # config: block_type='loftr', attention='linear' (small demo shapes; tune/benchmark
    # at realistic LoFTR sizes L=S~4800, C=256 separately).
    d_model = 128         # lane-dense (multiple of 128)
    nhead = 8
    layer_names = ("self", "cross")
    N, H, W = 2, 8, 8     # L = S = 64

    key = jax.random.PRNGKey(0)
    k0, k1, kp = jax.random.split(key, 3)
    feat0 = jax.random.normal(k0, (N, d_model, H, W), jnp.float32)   # NCHW
    feat1 = jax.random.normal(k1, (N, d_model, H, W), jnp.float32)   # NCHW

    layer_keys = jax.random.split(kp, len(layer_names))
    layer_params = tuple(init_layer_params(k, d_model) for k in layer_keys)

    out0, out1 = local_feature_transformer(feat0, feat1, layer_params,
                                           layer_names=layer_names, nhead=nhead)
    out0 = jax.block_until_ready(out0)
    out1 = jax.block_until_ready(out1)

    assert out0.shape == (N, H * W, d_model) and out1.shape == (N, H * W, d_model)

    ref0, ref1 = _ref_forward(feat0, feat1, layer_params, layer_names, nhead)
    assert jnp.allclose(out0, ref0, rtol=2e-2, atol=2e-2), "feat0 mismatch"
    assert jnp.allclose(out1, ref1, rtol=2e-2, atol=2e-2), "feat1 mismatch"

    print("KERNEL_OK")
</pallas_src>

<mosaic_0001>
module attributes {stable_mosaic.version = 11 : i64} {
  func.func @kv_kernel(%arg0: i32, %arg1: i32, %arg2: i32, %arg3: memref<1x64x128xbf16, #tpu.memory_space<vmem>>, %arg4: memref<128x256xbf16, #tpu.memory_space<vmem>>, %arg5: memref<1x1x128x128xf32, #tpu.memory_space<vmem>>, %arg6: memref<1x1x1x128xf32, #tpu.memory_space<vmem>>, %arg7: memref<128x128xf32, #tpu.memory_space<vmem>>, %arg8: memref<1x128xf32, #tpu.memory_space<vmem>>) attributes {dimension_semantics = [#tpu.dimension_semantics<parallel>, #tpu.dimension_semantics<parallel>, #tpu.dimension_semantics<arbitrary>], iteration_bounds = array<i64: 2, 1, 1>, scalar_prefetch = 0 : i64, scratch_operands = 2 : i64, tpu.core_type = #tpu.core_type<tc>, window_params = [{transform_indices = @transform_0, window_bounds = array<i64: 1, 64, 128>}, {pipeline_mode = #tpu.pipeline_mode<synchronous>, transform_indices = @transform_1, window_bounds = array<i64: 128, 256>}, {transform_indices = @transform_2, window_bounds = array<i64: 1, 1, 128, 128>}, {transform_indices = @transform_3, window_bounds = array<i64: 1, 1, 1, 128>}]} {
    %c0_i32 = arith.constant 0 : i32
    %0 = arith.cmpi eq, %arg2, %c0_i32 : i32
    %1 = arith.extui %0 : i1 to i32
    %c0_i32_0 = arith.constant 0 : i32
    %2 = arith.cmpi ne, %1, %c0_i32_0 : i32
    scf.if %2 {
      %cst_19 = arith.constant 0.000000e+00 : f32
      %29 = vector.broadcast %cst_19 : f32 to vector<128x128xf32>
      %c0_20 = arith.constant 0 : index
      %c0_21 = arith.constant 0 : index
      %30 = vector.load %arg7[%c0_20, %c0_21] : memref<128x128xf32, #tpu.memory_space<vmem>>, vector<128x128xf32>
      tpu.vector_store %arg7[%c0_20, %c0_21], %29 {strides = array<i32>} : memref<128x128xf32, #tpu.memory_space<vmem>>, vector<128x128xf32>,
      %cst_22 = arith.constant 0.000000e+00 : f32
      %31 = vector.broadcast %cst_22 : f32 to vector<1x128xf32>
      %c0_23 = arith.constant 0 : index
      %c0_24 = arith.constant 0 : index
      %32 = vector.load %arg8[%c0_23, %c0_24] : memref<1x128xf32, #tpu.memory_space<vmem>>, vector<1x128xf32>
      tpu.vector_store %arg8[%c0_23, %c0_24], %31 {strides = array<i32>} : memref<1x128xf32, #tpu.memory_space<vmem>>, vector<1x128xf32>,
    } else {
    }
    %c0 = arith.constant 0 : index
    %c0_1 = arith.constant 0 : index
    %c0_2 = arith.constant 0 : index
    %3 = vector.load %arg3[%c0, %c0_1, %c0_2] : memref<1x64x128xbf16, #tpu.memory_space<vmem>>, vector<1x64x128xbf16>
    %4 = vector.shape_cast %3 : vector<1x64x128xbf16> to vector<64x128xbf16>
    %c0_3 = arith.constant 0 : index
    %c0_4 = arith.constant 0 : index
    %5 = vector.load %arg4[%c0_3, %c0_4] : memref<128x256xbf16, #tpu.memory_space<vmem>>, vector<128x256xbf16>
    %cst = arith.constant dense<0.000000e+00> : vector<64x256xf32>
    %6 = tpu.matmul %4, %5, %cst {dimension_numbers = #tpu.dot_dimension_numbers<[1], [0], [0], [1], [0, 0, 1, 1], [], []>} : vector<64x128xbf16>, vector<128x256xbf16>, vector<64x256xf32> -> vector<64x256xf32>
    %7 = vector.extract_strided_slice %6 {offsets = [0, 0], sizes = [64, 128], strides = [1, 1]} : vector<64x256xf32> to vector<64x128xf32>
    %8 = vector.extract_strided_slice %6 {offsets = [0, 128], sizes = [64, 128], strides = [1, 1]} : vector<64x256xf32> to vector<64x128xf32>
    %cst_5 = arith.constant 0.000000e+00 : f32
    %9 = vector.broadcast %cst_5 : f32 to vector<64x128xf32>
    %10 = arith.cmpf ogt, %7, %9 : vector<64x128xf32>
    %cst_6 = arith.constant 1.000000e+00 : f32
    %11 = vector.broadcast %cst_6 : f32 to vector<64x128xf32>
    %12 = arith.addf %7, %11 : vector<64x128xf32>
    %13 = math.exp %7 : vector<64x128xf32>
    %14 = arith.select %10, %12, %13 : vector<64x128xi1>, vector<64x128xf32>
    %c0_7 = arith.constant 0 : index
    %c0_8 = arith.constant 0 : index
    %15 = vector.load %arg7[%c0_7, %c0_8] : memref<128x128xf32, #tpu.memory_space<vmem>>, vector<128x128xf32>
    %16 = arith.truncf %14 : vector<64x128xf32> to vector<64x128xbf16>
    %17 = arith.truncf %8 : vector<64x128xf32> to vector<64x128xbf16>
    %cst_9 = arith.constant dense<0.000000e+00> : vector<128x128xf32>
    %18 = tpu.matmul %16, %17, %cst_9 {dimension_numbers = #tpu.dot_dimension_numbers<[0], [0], [1], [1], [0, 1, 1, 1], [], []>} : vector<64x128xbf16>, vector<64x128xbf16>, vector<128x128xf32> -> vector<128x128xf32>
    %19 = arith.addf %15, %18 : vector<128x128xf32>
    %c0_10 = arith.constant 0 : index
    %c0_11 = arith.constant 0 : index
    %20 = vector.load %arg7[%c0_10, %c0_11] : memref<128x128xf32, #tpu.memory_space<vmem>>, vector<128x128xf32>
    tpu.vector_store %arg7[%c0_10, %c0_11], %19 {strides = array<i32>} : memref<128x128xf32, #tpu.memory_space<vmem>>, vector<128x128xf32>,
    %c0_12 = arith.constant 0 : index
    %c0_13 = arith.constant 0 : index
    %21 = vector.load %arg8[%c0_12, %c0_13] : memref<1x128xf32, #tpu.memory_space<vmem>>, vector<1x128xf32>
    %cst_14 = arith.constant dense<0.000000e+00> : vector<128xf32>
    %22 = vector.multi_reduction <add>, %14, %cst_14 [0] : vector<64x128xf32> to vector<128xf32>
    %23 = vector.shape_cast %22 : vector<128xf32> to vector<1x128xf32>
    %24 = arith.addf %21, %23 : vector<1x128xf32>
    %c0_15 = arith.constant 0 : index
    %c0_16 = arith.constant 0 : index
    %25 = vector.load %arg8[%c0_15, %c0_16] : memref<1x128xf32, #tpu.memory_space<vmem>>, vector<1x128xf32>
    tpu.vector_store %arg8[%c0_15, %c0_16], %24 {strides = array<i32>} : memref<1x128xf32, #tpu.memory_space<vmem>>, vector<1x128xf32>,
    %c0_i32_17 = arith.constant 0 : i32
    %26 = arith.cmpi eq, %arg2, %c0_i32_17 : i32
    %27 = arith.extui %26 : i1 to i32
    %c0_i32_18 = arith.constant 0 : i32
    %28 = arith.cmpi ne, %27, %c0_i32_18 : i32
    scf.if %28 {
      %c0_19 = arith.constant 0 : index
      %c0_20 = arith.constant 0 : index
      %29 = vector.load %arg7[%c0_19, %c0_20] : memref<128x128xf32, #tpu.memory_space<vmem>>, vector<128x128xf32>
      %c0_21 = arith.constant 0 : index
      %c0_22 = arith.constant 0 : index
      %c0_23 = arith.constant 0 : index
      %c0_24 = arith.constant 0 : index
      %30 = vector.load %arg5[%c0_21, %c0_22, %c0_23, %c0_24] : memref<1x1x128x128xf32, #tpu.memory_space<vmem>>, vector<1x1x128x128xf32>
      %31 = vector.shape_cast %30 : vector<1x1x128x128xf32> to vector<128x128xf32>
      %32 = vector.shape_cast %29 : vector<128x128xf32> to vector<1x1x128x128xf32>
      tpu.vector_store %arg5[%c0_21, %c0_22, %c0_23, %c0_24], %32 {strides = array<i32>} : memref<1x1x128x128xf32, #tpu.memory_space<vmem>>, vector<1x1x128x128xf32>,
      %c0_25 = arith.constant 0 : index
      %c0_26 = arith.constant 0 : index
      %33 = vector.load %arg8[%c0_25, %c0_26] : memref<1x128xf32, #tpu.memory_space<vmem>>, vector<1x128xf32>
      %c0_27 = arith.constant 0 : index
      %c0_28 = arith.constant 0 : index
      %c0_29 = arith.constant 0 : index
      %c0_30 = arith.constant 0 : index
      %34 = vector.load %arg6[%c0_27, %c0_28, %c0_29, %c0_30] : memref<1x1x1x128xf32, #tpu.memory_space<vmem>>, vector<1x1x1x128xf32>
      %35 = vector.shape_cast %34 : vector<1x1x1x128xf32> to vector<1x128xf32>
      %36 = vector.shape_cast %33 : vector<1x128xf32> to vector<1x1x1x128xf32>
      tpu.vector_store %arg6[%c0_27, %c0_28, %c0_29, %c0_30], %36 {strides = array<i32>} : memref<1x1x1x128xf32, #tpu.memory_space<vmem>>, vector<1x1x1x128xf32>,
    } else {
    }
    return
  }
  func.func @transform_0(%arg0: i32, %arg1: i32, %arg2: i32) -> (i32, i32, i32) {
    %c1_i32 = arith.constant 1 : i32
    %0 = arith.muli %arg1, %c1_i32 : i32
    %1 = arith.addi %0, %arg2 : i32
    %c0_i32 = arith.constant 0 : i32
    %c0_i32_0 = arith.constant 0 : i32
    return %arg0, %1, %c0_i32 : i32, i32, i32
  }
  func.func @transform_1(%arg0: i32, %arg1: i32, %arg2: i32) -> (i32, i32) {
    %c0_i32 = arith.constant 0 : i32
    %c0_i32_0 = arith.constant 0 : i32
    %c0_i32_1 = arith.constant 0 : i32
    return %c0_i32, %c0_i32_0 : i32, i32
  }
  func.func @transform_2(%arg0: i32, %arg1: i32, %arg2: i32) -> (i32, i32, i32, i32) {
    %c0_i32 = arith.constant 0 : i32
    %c0_i32_0 = arith.constant 0 : i32
    %c0_i32_1 = arith.constant 0 : i32
    return %arg0, %arg1, %c0_i32, %c0_i32_0 : i32, i32, i32, i32
  }
  func.func @transform_3(%arg0: i32, %arg1: i32, %arg2: i32) -> (i32, i32, i32, i32) {
    %c0_i32 = arith.constant 0 : i32
    %c0_i32_0 = arith.constant 0 : i32
    %c0_i32_1 = arith.constant 0 : i32
    return %arg0, %arg1, %c0_i32, %c0_i32_0 : i32, i32, i32, i32
  }
}

module attributes {stable_mosaic.version = 11 : i64} {
  func.func @apply_kernel(%arg0: i32, %arg1: i32, %arg2: memref<1x64x128xbf16, #tpu.memory_space<vmem>>, %arg3: memref<1x128x256xbf16, #tpu.memory_space<vmem>>, %arg4: memref<128x384xbf16, #tpu.memory_space<vmem>>, %arg5: memref<128x128xbf16, #tpu.memory_space<vmem>>, %arg6: memref<128x256xbf16, #tpu.memory_space<vmem>>, %arg7: memref<256x128xbf16, #tpu.memory_space<vmem>>, %arg8: memref<4x128xf32, #tpu.memory_space<vmem>>, %arg9: memref<1x64x128xbf16, #tpu.memory_space<vmem>>) attributes {dimension_semantics = [#tpu.dimension_semantics<parallel>, #tpu.dimension_semantics<parallel>], iteration_bounds = array<i64: 2, 1>, scalar_prefetch = 0 : i64, scratch_operands = 0 : i64, tpu.core_type = #tpu.core_type<tc>, window_params = [{transform_indices = @transform_0, window_bounds = array<i64: 1, 64, 128>}, {transform_indices = @transform_1, window_bounds = array<i64: 1, 128, 256>}, {pipeline_mode = #tpu.pipeline_mode<synchronous>, transform_indices = @transform_2, window_bounds = array<i64: 128, 384>}, {pipeline_mode = #tpu.pipeline_mode<synchronous>, transform_indices = @transform_3, window_bounds = array<i64: 128, 128>}, {pipeline_mode = #tpu.pipeline_mode<synchronous>, transform_indices = @transform_4, window_bounds = array<i64: 128, 256>}, {pipeline_mode = #tpu.pipeline_mode<synchronous>, transform_indices = @transform_5, window_bounds = array<i64: 256, 128>}, {pipeline_mode = #tpu.pipeline_mode<synchronous>, transform_indices = @transform_6, window_bounds = array<i64: 4, 128>}, {transform_indices = @transform_7, window_bounds = array<i64: 1, 64, 128>}]} {
    %c0 = arith.constant 0 : index
    %c0_0 = arith.constant 0 : index
    %c0_1 = arith.constant 0 : index
    %0 = vector.load %arg2[%c0, %c0_0, %c0_1] : memref<1x64x128xbf16, #tpu.memory_space<vmem>>, vector<1x64x128xbf16>
    %1 = vector.shape_cast %0 : vector<1x64x128xbf16> to vector<64x128xbf16>
    %c0_2 = arith.constant 0 : index
    %c0_3 = arith.constant 0 : index
    %2 = vector.load %arg4[%c0_2, %c0_3] : memref<128x384xbf16, #tpu.memory_space<vmem>>, vector<128x384xbf16>
    %cst = arith.constant dense<0.000000e+00> : vector<64x384xf32>
    %3 = tpu.matmul %1, %2, %cst {dimension_numbers = #tpu.dot_dimension_numbers<[1], [0], [0], [1], [0, 0, 1, 1], [], []>} : vector<64x128xbf16>, vector<128x384xbf16>, vector<64x384xf32> -> vector<64x384xf32>
    %4 = vector.extract_strided_slice %3 {offsets = [0, 0], sizes = [64, 128], strides = [1, 1]} : vector<64x384xf32> to vector<64x128xf32>
    %5 = vector.extract_strided_slice %3 {offsets = [0, 128], sizes = [64, 256], strides = [1, 1]} : vector<64x384xf32> to vector<64x256xf32>
    %cst_4 = arith.constant 0.000000e+00 : f32
    %6 = vector.broadcast %cst_4 : f32 to vector<64x128xf32>
    %7 = arith.cmpf ogt, %4, %6 : vector<64x128xf32>
    %cst_5 = arith.constant 1.000000e+00 : f32
    %8 = vector.broadcast %cst_5 : f32 to vector<64x128xf32>
    %9 = arith.addf %4, %8 : vector<64x128xf32>
    %10 = math.exp %4 : vector<64x128xf32>
    %11 = arith.select %7, %9, %10 : vector<64x128xi1>, vector<64x128xf32>
    %12 = arith.truncf %11 : vector<64x128xf32> to vector<64x128xbf16>
    %c0_6 = arith.constant 0 : index
    %c0_7 = arith.constant 0 : index
    %c0_8 = arith.constant 0 : index
    %13 = vector.load %arg3[%c0_6, %c0_7, %c0_8] : memref<1x128x256xbf16, #tpu.memory_space<vmem>>, vector<1x128x256xbf16>
    %14 = vector.shape_cast %13 : vector<1x128x256xbf16> to vector<128x256xbf16>
    %cst_9 = arith.constant dense<0.000000e+00> : vector<64x256xf32>
    %15 = tpu.matmul %12, %14, %cst_9 {dimension_numbers = #tpu.dot_dimension_numbers<[1], [0], [0], [1], [0, 0, 1, 1], [], []>} : vector<64x128xbf16>, vector<128x256xbf16>, vector<64x256xf32> -> vector<64x256xf32>
    %16 = vector.extract_strided_slice %15 {offsets = [0, 0], sizes = [64, 128], strides = [1, 1]} : vector<64x256xf32> to vector<64x128xf32>
    %17 = vector.extract_strided_slice %15 {offsets = [0, 128], sizes = [64, 128], strides = [1, 1]} : vector<64x256xf32> to vector<64x128xf32>
    %cst_10 = arith.constant 1.562500e-08 : f32
    %18 = vector.broadcast %cst_10 : f32 to vector<64x128xf32>
    %19 = arith.addf %17, %18 : vector<64x128xf32>
    %20 = tpu.reciprocal %19 : vector<64x128xf32> -> vector<64x128xf32>
    %21 = arith.mulf %16, %20 : vector<64x128xf32>
    %22 = arith.truncf %21 : vector<64x128xf32> to vector<64x128xbf16>
    %c0_11 = arith.constant 0 : index
    %c0_12 = arith.constant 0 : index
    %23 = vector.load %arg5[%c0_11, %c0_12] : memref<128x128xbf16, #tpu.memory_space<vmem>>, vector<128x128xbf16>
    %cst_13 = arith.constant dense<0.000000e+00> : vector<64x128xf32>
    %24 = tpu.matmul %22, %23, %cst_13 {dimension_numbers = #tpu.dot_dimension_numbers<[1], [0], [0], [1], [0, 0, 1, 1], [], []>} : vector<64x128xbf16>, vector<128x128xbf16>, vector<64x128xf32> -> vector<64x128xf32>
    %c0_14 = arith.constant 0 : index
    %c0_15 = arith.constant 0 : index
    %25 = vector.load %arg8[%c0_14, %c0_15] : memref<4x128xf32, #tpu.memory_space<vmem>>, vector<4x128xf32>
    %26 = vector.extract_strided_slice %25 {offsets = [0, 0], sizes = [1, 128], strides = [1, 1]} : vector<4x128xf32> to vector<1x128xf32>
    %27 = vector.extract_strided_slice %25 {offsets = [1, 0], sizes = [1, 128], strides = [1, 1]} : vector<4x128xf32> to vector<1x128xf32>
    %cst_16 = arith.constant dense<0.000000e+00> : vector<64xf32>
    %28 = vector.multi_reduction <add>, %24, %cst_16 [1] : vector<64x128xf32> to vector<64xf32>
    %29 = vector.shape_cast %28 : vector<64xf32> to vector<64x1xf32>
    %cst_17 = arith.constant 1.280000e+02 : f32
    %30 = vector.broadcast %cst_17 : f32 to vector<64x1xf32>
    %31 = arith.divf %29, %30 : vector<64x1xf32>
    %32 = arith.mulf %24, %24 : vector<64x128xf32>
    %cst_18 = arith.constant dense<0.000000e+00> : vector<64xf32>
    %33 = vector.multi_reduction <add>, %32, %cst_18 [1] : vector<64x128xf32> to vector<64xf32>
    %34 = vector.shape_cast %33 : vector<64xf32> to vector<64x1xf32>
    %cst_19 = arith.constant 1.280000e+02 : f32
    %35 = vector.broadcast %cst_19 : f32 to vector<64x1xf32>
    %36 = arith.divf %34, %35 : vector<64x1xf32>
    %37 = arith.mulf %31, %31 : vector<64x1xf32>
    %38 = arith.subf %36, %37 : vector<64x1xf32>
    %cst_20 = arith.constant 0.000000e+00 : f32
    %39 = vector.broadcast %cst_20 : f32 to vector<64x1xf32>
    %40 = arith.maximumf %38, %39 : vector<64x1xf32>
    %41 = vector.broadcast %31 : vector<64x1xf32> to vector<64x128xf32>
    %42 = arith.subf %24, %41 : vector<64x128xf32>
    %cst_21 = arith.constant 9.99999974E-6 : f32
    %43 = vector.broadcast %cst_21 : f32 to vector<64x1xf32>
    %44 = arith.addf %40, %43 : vector<64x1xf32>
    %45 = math.rsqrt %44 : vector<64x1xf32>
    %46 = vector.broadcast %45 : vector<64x1xf32> to vector<64x128xf32>
    %47 = arith.mulf %42, %46 : vector<64x128xf32>
    %48 = vector.broadcast %26 : vector<1x128xf32> to vector<64x128xf32>
    %49 = arith.mulf %47, %48 : vector<64x128xf32>
    %50 = vector.broadcast %27 : vector<1x128xf32> to vector<64x128xf32>
    %51 = arith.addf %49, %50 : vector<64x128xf32>
    %52 = arith.truncf %51 : vector<64x128xf32> to vector<64x128xbf16>
    %c0_22 = arith.constant 0 : index
    %c0_23 = arith.constant 0 : index
    %53 = vector.load %arg6[%c0_22, %c0_23] : memref<128x256xbf16, #tpu.memory_space<vmem>>, vector<128x256xbf16>
    %cst_24 = arith.constant dense<0.000000e+00> : vector<64x256xf32>
    %54 = tpu.matmul %52, %53, %cst_24 {dimension_numbers = #tpu.dot_dimension_numbers<[1], [0], [0], [1], [0, 0, 1, 1], [], []>} : vector<64x128xbf16>, vector<128x256xbf16>, vector<64x256xf32> -> vector<64x256xf32>
    %55 = arith.addf %5, %54 : vector<64x256xf32>
    %cst_25 = arith.constant 0.000000e+00 : f32
    %56 = vector.broadcast %cst_25 : f32 to vector<64x256xf32>
    %57 = arith.maximumf %55, %56 : vector<64x256xf32>
    %58 = arith.truncf %57 : vector<64x256xf32> to vector<64x256xbf16>
    %c0_26 = arith.constant 0 : index
    %c0_27 = arith.constant 0 : index
    %59 = vector.load %arg7[%c0_26, %c0_27] : memref<256x128xbf16, #tpu.memory_space<vmem>>, vector<256x128xbf16>
    %cst_28 = arith.constant dense<0.000000e+00> : vector<64x128xf32>
    %60 = tpu.matmul %58, %59, %cst_28 {dimension_numbers = #tpu.dot_dimension_numbers<[1], [0], [0], [1], [0, 0, 1, 1], [], []>} : vector<64x256xbf16>, vector<256x128xbf16>, vector<64x128xf32> -> vector<64x128xf32>
    %61 = vector.extract_strided_slice %25 {offsets = [2, 0], sizes = [1, 128], strides = [1, 1]} : vector<4x128xf32> to vector<1x128xf32>
    %62 = vector.extract_strided_slice %25 {offsets = [3, 0], sizes = [1, 128], strides = [1, 1]} : vector<4x128xf32> to vector<1x128xf32>
    %cst_29 = arith.constant dense<0.000000e+00> : vector<64xf32>
    %63 = vector.multi_reduction <add>, %60, %cst_29 [1] : vector<64x128xf32> to vector<64xf32>
    %64 = vector.shape_cast %63 : vector<64xf32> to vector<64x1xf32>
    %cst_30 = arith.constant 1.280000e+02 : f32
    %65 = vector.broadcast %cst_30 : f32 to vector<64x1xf32>
    %66 = arith.divf %64, %65 : vector<64x1xf32>
    %67 = arith.mulf %60, %60 : vector<64x128xf32>
    %cst_31 = arith.constant dense<0.000000e+00> : vector<64xf32>
    %68 = vector.multi_reduction <add>, %67, %cst_31 [1] : vector<64x128xf32> to vector<64xf32>
    %69 = vector.shape_cast %68 : vector<64xf32> to vector<64x1xf32>
    %cst_32 = arith.constant 1.280000e+02 : f32
    %70 = vector.broadcast %cst_32 : f32 to vector<64x1xf32>
    %71 = arith.divf %69, %70 : vector<64x1xf32>
    %72 = arith.mulf %66, %66 : vector<64x1xf32>
    %73 = arith.subf %71, %72 : vector<64x1xf32>
    %cst_33 = arith.constant 0.000000e+00 : f32
    %74 = vector.broadcast %cst_33 : f32 to vector<64x1xf32>
    %75 = arith.maximumf %73, %74 : vector<64x1xf32>
    %76 = vector.broadcast %66 : vector<64x1xf32> to vector<64x128xf32>
    %77 = arith.subf %60, %76 : vector<64x128xf32>
    %cst_34 = arith.constant 9.99999974E-6 : f32
    %78 = vector.broadcast %cst_34 : f32 to vector<64x1xf32>
    %79 = arith.addf %75, %78 : vector<64x1xf32>
    %80 = math.rsqrt %79 : vector<64x1xf32>
    %81 = vector.broadcast %80 : vector<64x1xf32> to vector<64x128xf32>
    %82 = arith.mulf %77, %81 : vector<64x128xf32>
    %83 = vector.broadcast %61 : vector<1x128xf32> to vector<64x128xf32>
    %84 = arith.mulf %82, %83 : vector<64x128xf32>
    %85 = vector.broadcast %62 : vector<1x128xf32> to vector<64x128xf32>
    %86 = arith.addf %84, %85 : vector<64x128xf32>
    %87 = arith.extf %1 : vector<64x128xbf16> to vector<64x128xf32>
    %88 = arith.addf %87, %86 : vector<64x128xf32>
    %89 = arith.truncf %88 : vector<64x128xf32> to vector<64x128xbf16>
    %c0_35 = arith.constant 0 : index
    %c0_36 = arith.constant 0 : index
    %c0_37 = arith.constant 0 : index
    %90 = vector.load %arg9[%c0_35, %c0_36, %c0_37] : memref<1x64x128xbf16, #tpu.memory_space<vmem>>, vector<1x64x128xbf16>
    %91 = vector.shape_cast %90 : vector<1x64x128xbf16> to vector<64x128xbf16>
    %92 = vector.shape_cast %89 : vector<64x128xbf16> to vector<1x64x128xbf16>
    tpu.vector_store %arg9[%c0_35, %c0_36, %c0_37], %92 {strides = array<i32>} : memref<1x64x128xbf16, #tpu.memory_space<vmem>>, vector<1x64x128xbf16>,
    return
  }
  func.func @transform_0(%arg0: i32, %arg1: i32) -> (i32, i32, i32) {
    %c0_i32 = arith.constant 0 : i32
    %c0_i32_0 = arith.constant 0 : i32
    return %arg0, %arg1, %c0_i32 : i32, i32, i32
  }
  func.func @transform_1(%arg0: i32, %arg1: i32) -> (i32, i32, i32) {
    %c0_i32 = arith.constant 0 : i32
    %c0_i32_0 = arith.constant 0 : i32
    %c0_i32_1 = arith.constant 0 : i32
    return %arg0, %c0_i32, %c0_i32_0 : i32, i32, i32
  }
  func.func @transform_2(%arg0: i32, %arg1: i32) -> (i32, i32) {
    %c0_i32 = arith.constant 0 : i32
    %c0_i32_0 = arith.constant 0 : i32
    %c0_i32_1 = arith.constant 0 : i32
    return %c0_i32, %c0_i32_0 : i32, i32
  }
  func.func @transform_3(%arg0: i32, %arg1: i32) -> (i32, i32) {
    %c0_i32 = arith.constant 0 : i32
    %c0_i32_0 = arith.constant 0 : i32
    %c0_i32_1 = arith.constant 0 : i32
    return %c0_i32, %c0_i32_0 : i32, i32
  }
  func.func @transform_4(%arg0: i32, %arg1: i32) -> (i32, i32) {
    %c0_i32 = arith.constant 0 : i32
    %c0_i32_0 = arith.constant 0 : i32
    %c0_i32_1 = arith.constant 0 : i32
    return %c0_i32, %c0_i32_0 : i32, i32
  }
  func.func @transform_5(%arg0: i32, %arg1: i32) -> (i32, i32) {
    %c0_i32 = arith.constant 0 : i32
    %c0_i32_0 = arith.constant 0 : i32
    %c0_i32_1 = arith.constant 0 : i32
    return %c0_i32, %c0_i32_0 : i32, i32
  }
  func.func @transform_6(%arg0: i32, %arg1: i32) -> (i32, i32) {
    %c0_i32 = arith.constant 0 : i32
    %c0_i32_0 = arith.constant 0 : i32
    %c0_i32_1 = arith.constant 0 : i32
    return %c0_i32, %c0_i32_0 : i32, i32
  }
  func.func @transform_7(%arg0: i32, %arg1: i32) -> (i32, i32, i32) {
    %c0_i32 = arith.constant 0 : i32
    %c0_i32_0 = arith.constant 0 : i32
    return %arg0, %arg1, %c0_i32 : i32, i32, i32
  }
}

</mosaic_0001>

<bundles_post_ra>
// kernel: local_feature_transformer.10
= control target key start
LH: loop header
LB: loop body
LE: loop exit
PB: predicated region body
PF: predicated region fallthrough
CT: control target
= control target key end

     0   :  { %s1070_s12 = smov 0   ;;  %s1072_s13 = smov 0   ;;  %s1185_s0 = inlined_call_operand.vmem [shape: bf16[2,64,128], index: 0, kind: input, shape index: {}]   ;;  %s1186_s1 = inlined_call_operand.vmem [shape: bf16[128,256], index: 1, kind: input, shape index: {}]   ;;  %s1187_s2 = inlined_call_operand.vmem [shape: f32[2,1,128,128], index: 2, kind: output, shape index: {0}]   ;;  %s1188_s3 = inlined_call_operand.vmem [shape: f32[2,1,1,128], index: 3, kind: output, shape index: {1}]  }
   0x1   :  { %s1074_s14 = smov 0  }
   0x2 LB: > { %s33_s15 = sadd.s32 1, %s1042_s13  ;;  %p881_p0 = scmp.ge.s32.totalorder %s1046_s14, 1  ;;  %s1046_s14 = sphi %s1074_s14, %s14_s14   ;;  %s1042_s13 = sphi %s1072_s13, %s1190_s13   ;;  %s1038_s12 = sphi %s1070_s12, %s1189_s12  }
   0x3   : > { %p35_p1 = scmp.ge.s32.totalorder %s33_s15, 2  ;;  %p174_p2 = scmp.lt.s32.totalorder %s1046_s14, 3 }
   0x5   : > { %s1192_s15 = smov (%p35_p1, %s33_s15), 0  ;;  %p175_p3 = pnand %p881_p0, %p174_p2 }
   0x6   : > { %v980_v0 = vld [vmem:[%s1186_s1 + $0x4] ss:$8 sps:$4 sm:$0xff] (!%p175_p3)   ;;  %p215_p4 = scmp.lt.s32.totalorder (!%p175_p3), %s1038_s12, 1  ;;  %v982_v1 = vld [vmem:[%s1186_s1] ss:$8 sps:$4 sm:$0xff] (!%p175_p3)   ;;  %v1048_v2 = vmov (!%p175_p3), 0  }
   0x7   : > { %178 = sbr.rel (%p175_p3) target bundleno = 628 (0x274), region = 28  ;;  %422 = vmatprep.mubr.bf16.mxu0 (!%p175_p3), %v1048_v2  ;;  %390 = vmatprep.subr.bf16.mxu0 (!%p175_p3), %v980_v0  ;;  %v983_v3 = vld [vmem:[%s1186_s1 + $0x14] ss:$8 sps:$4 sm:$0xff] (!%p175_p3)   ;;  %v985_v4 = vld [vmem:[%s1186_s1 + $0x10] ss:$8 sps:$4 sm:$0xff] (!%p175_p3)   ;;  %v1049_v21 = vmov (!%p175_p3), 0.0  }
   0x8   : > { %391 = vmatpush1.bf16.msra.mxu0 (!%p175_p3), %v982_v1  ;;  %v986_v5 = vld [vmem:[%s1186_s1 + $0x24] ss:$8 sps:$4 sm:$0xff] (!%p175_p3)   ;;  %v988_v6 = vld [vmem:[%s1186_s1 + $0x20] ss:$8 sps:$4 sm:$0xff] (!%p175_p3)   ;;  %v989_v7 = vld [vmem:[%s1186_s1 + $0x34] ss:$8 sps:$4 sm:$0xff] (!%p175_p3)  }
   0x9   : > { %392 = vmatprep.subr.bf16.mxu0 (!%p175_p3), %v983_v3  ;;  %v991_v8 = vld [vmem:[%s1186_s1 + $0x30] ss:$8 sps:$4 sm:$0xff] (!%p175_p3)   ;;  %v992_v9 = vld [vmem:[%s1186_s1 + $0x44] ss:$8 sps:$4 sm:$0xff] (!%p175_p3)   ;;  %v994_v10 = vld [vmem:[%s1186_s1 + $0x40] ss:$8 sps:$4 sm:$0xff] (!%p175_p3)  }
   0xa   : > { %v995_v11 = vld [vmem:[%s1186_s1 + $0x54] ss:$8 sps:$4 sm:$0xff] (!%p175_p3)   ;;  %v997_v12 = vld [vmem:[%s1186_s1 + $0x50] ss:$8 sps:$4 sm:$0xff] (!%p175_p3)   ;;  %v998_v13 = vld [vmem:[%s1186_s1 + $0x64] ss:$8 sps:$4 sm:$0xff] (!%p175_p3)  }
   0xb   : > { %v1000_v14 = vld [vmem:[%s1186_s1 + $0x60] ss:$8 sps:$4 sm:$0xff] (!%p175_p3)   ;;  %v1001_v15 = vld [vmem:[%s1186_s1 + $0x74] ss:$8 sps:$4 sm:$0xff] (!%p175_p3)   ;;  %v1003_v16 = vld [vmem:[%s1186_s1 + $0x70] ss:$8 sps:$4 sm:$0xff] (!%p175_p3)  }
   0xc   : > { %393 = vmatpush1.bf16.msra.mxu0 (!%p175_p3), %v985_v4  ;;  %261 = vst [vmem:[#allocation3] sm:$0x1] (!%p175_p3), %v1049_v21  ;;  %vm543_vm8 = vcmask (!%p175_p3), 523264  }
   0xd   : > { %394 = vmatprep.subr.bf16.mxu0 (!%p175_p3), %v986_v5 }
   0xe   : > { %s1194_s12 = smov (!%p215_p4, %s1038_s12), 1 }
   0xf   : > { %s916_s26 = sshll.u32 %s1194_s12, 5  ;;  %s239_s4 = scalar_lea.vmem %s1188_s3, %s1194_s12 }
  0x10   : > { %s222_s6 = scalar_lea.vmem %s1185_s0, %s916_s26  ;;  %395 = vmatpush1.bf16.msra.mxu0 %v988_v6  ;;  %s917_s5 = sshll.u32 %s1194_s12, 7 }
  0x11   : > { %396 = vmatprep.subr.bf16.mxu0 %v989_v7  ;;  %v1004_v17 = vld [vmem:[%s222_s6] sm:$0xff]   ;;  %v1005_v18 = vld [vmem:[%s222_s6 + $0x8] sm:$0xff]   ;;  %v1006_v19 = vld [vmem:[%s222_s6 + $0x10] sm:$0xff]   ;;  %s1158_s8 = scalar_lea.vmem %s1187_s2, %s917_s5 }
  0x12   : > { %v1007_v20 = vld [vmem:[%s222_s6 + $0x18] sm:$0xff]  }
  0x14   : > { %397 = vmatpush1.bf16.msra.mxu0 %v991_v8 }
  0x15   : > { %398 = vmatprep.subr.bf16.mxu0 %v992_v9 }
  0x18   : > { %399 = vmatpush1.bf16.msra.mxu0 %v994_v10 }
  0x19   : > { %400 = vmatprep.subr.bf16.mxu0 %v995_v11 }
  0x1c   : > { %401 = vmatpush1.bf16.msra.mxu0 %v997_v12 }
  0x1d   : > { %402 = vmatprep.subr.bf16.mxu0 %v998_v13 }
  0x20   : > { %403 = vmatpush1.bf16.msra.mxu0 %v1000_v14 }
  0x21   : > { %404 = vmatprep.subr.bf16.mxu0 %v1001_v15 }
  0x24   : > { %405 = vmatpush1.bf16.msra.mxu0 %v1003_v16 }
  0x27   : > { %423 = vmatmul.mubr.bf16.vlgmr.msra.gmra.mrb[0].mxu0 %v1004_v17 }
  0x28   : > { %432 = vmatprep.mubr.bf16.mxu0 %v1048_v2 }
  0x2f   : > { %433 = vmatmul.mubr.bf16.gmra.mrb[4].mxu0 %v1005_v18 }
  0x30   : > { %442 = vmatprep.mubr.bf16.mxu0 %v1048_v2 }
  0x37   : > { %443 = vmatmul.mubr.bf16.gmra.mrb[8].mxu0 %v1006_v19 }
  0x38   : > { %452 = vmatprep.mubr.bf16.mxu0 %v1048_v2 }
  0x3f   : > { %453 = vmatmul.mubr.bf16.gmra.mrb[12].mxu0 %v1007_v20 }
  0xfa   : > { %v424_v22 = vpop.f32.mrb[0].mxu0 }
  0xfb   : > { %v479_v23 = vmul.f32 1.442695, %v424_v22  ;;  %v426_v24 = vpop.f32.mrb[1].mxu0  ;;  %v471_v37 = vadd.f32 1.0, %v424_v22  ;;  %vm463_vm0 = vcmp.gt.f32.partialorder %v424_v22, 0.0 }
  0xfc   : > { %v428_v25 = vpop.f32.mrb[2].mxu0 }
  0xfd   : > { %1008 = vpow2.f32 %v479_v23  ;;  %v481_v26 = vmul.f32 1.442695, %v428_v25  ;;  %v430_v27 = vpop.f32.mrb[3].mxu0  ;;  %v472_v38 = vadd.f32 1.0, %v428_v25  ;;  %vm464_vm1 = vcmp.gt.f32.partialorder %v428_v25, 0.0 }
  0xfe   : > { %v523_v28 = vpack.c.bf16 %v430_v27, %v426_v24 }
  0xff   : > { %1010 = vpow2.f32 %v481_v26  ;;  %v697_v26 = vld [vmem:[#allocation3] sm:$0x1] }
 0x100   : > { %930 = vmatprep.subr.bf16.mxu1 %v523_v28 }
 0x101   : > { %931 = vmatpush3.bf16.msra.mxu1 %v523_v28 }
 0x102   : > { %v434_v29 = vpop.f32.mrb[4].mxu0 }
 0x103   : > { %v483_v30 = vmul.f32 1.442695, %v434_v29  ;;  %v436_v31 = vpop.f32.mrb[5].mxu0  ;;  %v473_v50 = vadd.f32 1.0, %v434_v29  ;;  %vm465_vm2 = vcmp.gt.f32.partialorder %v434_v29, 0.0 }
 0x104   : > { %v438_v32 = vpop.f32.mrb[6].mxu0 }
 0x105   : > { %1012 = vpow2.f32 %v483_v30  ;;  %v485_v33 = vmul.f32 1.442695, %v438_v32  ;;  %v440_v34 = vpop.f32.mrb[7].mxu0  ;;  %v474_v53 = vadd.f32 1.0, %v438_v32  ;;  %vm466_vm3 = vcmp.gt.f32.partialorder %v438_v32, 0.0 }
 0x106   : > { %v524_v35 = vpack.c.bf16 %v440_v34, %v436_v31 }
 0x107   : > { %v1009_v36 = vpop.eup %1008  ;;  %1014 = vpow2.f32 %v485_v33 }
 0x108   : > { %932 = vmatprep.subr.bf16.mxu1 %v524_v35  ;;  %v495_v41 = vsel %vm463_vm0, %v471_v37, %v1009_v36 }
 0x109   : > { %v1011_v39 = vpop.eup %1010  ;;  %933 = vmatpush3.bf16.msra.mxu1 %v524_v35 }
 0x10a   : > { %v444_v40 = vpop.f32.mrb[8].mxu0  ;;  %v496_v42 = vsel %vm464_vm1, %v472_v38, %v1011_v39 }
 0x10b   : > { %v487_v43 = vmul.f32 1.442695, %v444_v40  ;;  %v446_v44 = vpop.f32.mrb[9].mxu0  ;;  %v519_v45 = vpack.c.bf16 %v496_v42, %v495_v41  ;;  %v698_v47 = vadd.f32 %v496_v42, %v495_v41  ;;  %v475_v2 = vadd.f32 1.0, %v444_v40 }
 0x10c   : > { %v448_v46 = vpop.f32.mrb[10].mxu0  ;;  %vm467_vm4 = vcmp.gt.f32.partialorder %v444_v40, 0.0 }
 0x10d   : > { %1016 = vpow2.f32 %v487_v43  ;;  %v489_v48 = vmul.f32 1.442695, %v448_v46  ;;  %527 = vxpose.xlu0.c.b16.start [1/4] (short) %v519_v45, 128  ;;  %v450_v49 = vpop.f32.mrb[11].mxu0  ;;  %v476_v5 = vadd.f32 1.0, %v448_v46  ;;  %vm468_vm5 = vcmp.gt.f32.partialorder %v448_v46, 0.0 }
 0x10e   : > { %v525_v51 = vpack.c.bf16 %v450_v49, %v446_v44 }
 0x10f   : > { %v1013_v52 = vpop.eup %1012  ;;  %1018 = vpow2.f32 %v489_v48 }
 0x110   : > { %934 = vmatprep.subr.bf16.mxu1 %v525_v51  ;;  %v497_v54 = vsel %vm465_vm2, %v473_v50, %v1013_v52 }
 0x111   : > { %v1015_v55 = vpop.eup %1014  ;;  %935 = vmatpush3.bf16.msra.mxu1 %v525_v51  ;;  %v699_v56 = vadd.f32 %v698_v47, %v497_v54 }
 0x112   : > { %v454_v57 = vpop.f32.mrb[12].mxu0  ;;  %v498_v58 = vsel %vm466_vm3, %v474_v53, %v1015_v55 }
 0x113   : > { %v491_v59 = vmul.f32 1.442695, %v454_v57  ;;  %v456_v60 = vpop.f32.mrb[13].mxu0  ;;  %v520_v61 = vpack.c.bf16 %v498_v58, %v497_v54  ;;  %v700_v63 = vadd.f32 %v699_v56, %v498_v58  ;;  %v477_v12 = vadd.f32 1.0, %v454_v57 }
 0x114   : > { %v458_v62 = vpop.f32.mrb[14].mxu0  ;;  %vm469_vm6 = vcmp.gt.f32.partialorder %v454_v57, 0.0 }
 0x115   : > { %1020 = vpow2.f32 %v491_v59  ;;  %v493_v0 = vmul.f32 1.442695, %v458_v62  ;;  %528 = vxpose.xlu0.c.b16.cont [2/4] (short) %v520_v61, 128  ;;  %v460_v1 = vpop.f32.mrb[15].mxu0  ;;  %v478_v14 = vadd.f32 1.0, %v458_v62  ;;  %vm470_vm7 = vcmp.gt.f32.partialorder %v458_v62, 0.0 }
 0x116   : > { %v526_v3 = vpack.c.bf16 %v460_v1, %v456_v60 }
 0x117   : > { %v1017_v4 = vpop.eup %1016  ;;  %1022 = vpow2.f32 %v493_v0 }
 0x118   : > { %936 = vmatprep.subr.bf16.mxu1 %v526_v3  ;;  %v499_v6 = vsel %vm467_vm4, %v475_v2, %v1017_v4 }
 0x119   : > { %v1019_v7 = vpop.eup %1018  ;;  %937 = vmatpush3.bf16.msra.mxu1 %v526_v3  ;;  %v701_v8 = vadd.f32 %v700_v63, %v499_v6 }
 0x11a   : > { %v500_v9 = vsel %vm468_vm5, %v476_v5, %v1019_v7 }
 0x11b   : > { %v521_v10 = vpack.c.bf16 %v500_v9, %v499_v6  ;;  %v702_v11 = vadd.f32 %v701_v8, %v500_v9 }
 0x11d   : > { %529 = vxpose.xlu0.c.b16.cont [3/4] (short) %v521_v10, 128 }
 0x11f   : > { %v1021_v13 = vpop.eup %1020 }
 0x120   : > { %v501_v15 = vsel %vm469_vm6, %v477_v12, %v1021_v13 }
 0x121   : > { %v1023_v16 = vpop.eup %1022  ;;  %v703_v17 = vadd.f32 %v702_v11, %v501_v15 }
 0x122   : > { %v502_v18 = vsel %vm470_vm7, %v478_v14, %v1023_v16 }
 0x123   : > { %v522_v19 = vpack.c.bf16 %v502_v18, %v501_v15  ;;  %v704_v20 = vadd.f32 %v703_v17, %v502_v18 }
 0x125   : > { %v705_v21 = vrot.slane %v704_v20, 4  ;;  %530 = vxpose.xlu0.c.b16.end [4/4] (short) %v522_v19, 128 }
 0x127   : > { %v706_v22 = vadd.f32 %v705_v21, %v704_v20 }
 0x129   : > { %v707_v23 = vrot.slane %v706_v22, 2 }
 0x12b   : > { %v708_v24 = vadd.f32 %v707_v23, %v706_v22 }
 0x12d   : > { %v709_v25 = vrot.slane %v708_v24, 1 }
 0x12f   : > { %v710_v27 = vadd.f32 %v709_v25, %v708_v24 }
 0x131   : > { %v711_v28 = vadd.f32 %v710_v27, %v697_v26 }
 0x133   : > { %712 = vst [vmem:[#allocation3] sm:$0x1] %v711_v28 }
 0x13a   : > { %v748_v29 = vld [vmem:[#allocation3] sm:$0x1] }
 0x13b   : > { %749 = vst [vmem:[%s239_s4] sm:$0x1] %v748_v29 }
 0x17f   : > { %v535_v30 = vpop.trf.xlu0 }
 0x180   : > { %938 = vmatprep.mubr.msk.bf16.mxu1 %vm543_vm8, %v535_v30 }
 0x183   : > { %v536_v31 = vpop.trf.xlu0 }
 0x184   : > { %939 = vmatmul.mubr.msk.bf16.vlgmr.msra.gmra.mrb[0].mxu1 %vm543_vm8, %v536_v31 }
 0x187   : > { %v537_v32 = vpop.trf.xlu0 }
 0x188   : > { %942 = vmatprep.mubr.msk.bf16.mxu1 %vm543_vm8, %v537_v32 }
 0x18b   : > { %v538_v33 = vpop.trf.xlu0 }
 0x18c   : > { %943 = vmatmul.mubr.msk.bf16.gmra.mrb[4].mxu1 %vm543_vm8, %v538_v33 }
 0x18f   : > { %v539_v34 = vpop.trf.xlu0 }
 0x190   : > { %946 = vmatprep.mubr.msk.bf16.mxu1 %vm543_vm8, %v539_v34 }
 0x193   : > { %v540_v35 = vpop.trf.xlu0 }
 0x194   : > { %947 = vmatmul.mubr.msk.bf16.gmra.mrb[8].mxu1 %vm543_vm8, %v540_v35 }
 0x197   : > { %v541_v36 = vpop.trf.xlu0 }
 0x198   : > { %950 = vmatprep.mubr.msk.bf16.mxu1 %vm543_vm8, %v541_v36 }
 0x19b   : > { %v542_v37 = vpop.trf.xlu0 }
 0x19c   : > { %951 = vmatmul.mubr.msk.bf16.gmra.mrb[12].mxu1 %vm543_vm8, %v542_v37 }
 0x257   : > { %v940_v38 = vpop.f32.mrb[0].mxu1 }
 0x258   : > { %734 = vst [vmem:[%s1158_s8 + $0x10] sm:$0xff] %v940_v38  ;;  %v602_v39 = vpop.f32.mrb[1].mxu1 }
 0x259   : > { %732 = vst [vmem:[%s1158_s8] sm:$0xff] %v602_v39  ;;  %v941_v40 = vpop.f32.mrb[2].mxu1 }
 0x25a   : > { %735 = vst [vmem:[%s1158_s8 + $0x18] sm:$0xff] %v941_v40  ;;  %v605_v41 = vpop.f32.mrb[3].mxu1 }
 0x25b   : > { %733 = vst [vmem:[%s1158_s8 + $0x8] sm:$0xff] %v605_v41 }
 0x25f   : > { %v944_v42 = vpop.f32.mrb[4].mxu1 }
 0x260   : > { %738 = vst [vmem:[%s1158_s8 + $0x30] sm:$0xff] %v944_v42  ;;  %v618_v43 = vpop.f32.mrb[5].mxu1 }
 0x261   : > { %736 = vst [vmem:[%s1158_s8 + $0x20] sm:$0xff] %v618_v43  ;;  %v945_v44 = vpop.f32.mrb[6].mxu1 }
 0x262   : > { %739 = vst [vmem:[%s1158_s8 + $0x38] sm:$0xff] %v945_v44  ;;  %v621_v45 = vpop.f32.mrb[7].mxu1 }
 0x263   : > { %737 = vst [vmem:[%s1158_s8 + $0x28] sm:$0xff] %v621_v45 }
 0x267   : > { %v948_v46 = vpop.f32.mrb[8].mxu1 }
 0x268   : > { %742 = vst [vmem:[%s1158_s8 + $0x50] sm:$0xff] %v948_v46  ;;  %v634_v47 = vpop.f32.mrb[9].mxu1 }
 0x269   : > { %740 = vst [vmem:[%s1158_s8 + $0x40] sm:$0xff] %v634_v47  ;;  %v949_v48 = vpop.f32.mrb[10].mxu1 }
 0x26a   : > { %743 = vst [vmem:[%s1158_s8 + $0x58] sm:$0xff] %v949_v48  ;;  %v637_v49 = vpop.f32.mrb[11].mxu1 }
 0x26b   : > { %741 = vst [vmem:[%s1158_s8 + $0x48] sm:$0xff] %v637_v49 }
 0x26f   : > { %v952_v50 = vpop.f32.mrb[12].mxu1 }
 0x270   : > { %746 = vst [vmem:[%s1158_s8 + $0x70] sm:$0xff] %v952_v50  ;;  %v650_v51 = vpop.f32.mrb[13].mxu1 }
 0x271   : > { %744 = vst [vmem:[%s1158_s8 + $0x60] sm:$0xff] %v650_v51  ;;  %v953_v52 = vpop.f32.mrb[14].mxu1 }
 0x272   : > { %747 = vst [vmem:[%s1158_s8 + $0x78] sm:$0xff] %v953_v52  ;;  %v653_v53 = vpop.f32.mrb[15].mxu1 }
 0x273   : > { %745 = vst [vmem:[%s1158_s8 + $0x68] sm:$0xff] %v653_v53 }
 0x274 PF: > { %s14_s14 = sadd.s32 1, %s1046_s14   ;;  %s1189_s12 = smov %s1042_s13 }
 0x275   : > { %p11_p5 = scmp.ge.s32.totalorder %s14_s14, 4   ;;  %s1190_s13 = smov %s1192_s15 }
 0x277   :  { %13 = sbr.rel (!%p11_p5) target bundleno = 2 (0x2), region = 78 }

// kernel: local_feature_transformer.11
= control target key start
LH: loop header
LB: loop body
LE: loop exit
PB: predicated region body
PF: predicated region fallthrough
CT: control target
= control target key end

     0   :  { %s2395_s24 = smov 0   ;;  %s2397_s25 = smov 0   ;;  %s2920_s0 = inlined_call_operand.vmem [shape: bf16[2,64,128], index: 0, kind: input, shape index: {}]   ;;  %s2921_s1 = inlined_call_operand.vmem [shape: bf16[2,128,256], index: 1, kind: input, shape index: {}]   ;;  %s2922_s2 = inlined_call_operand.vmem [shape: bf16[128,384], index: 2, kind: input, shape index: {}]   ;;  %s2923_s3 = inlined_call_operand.vmem [shape: bf16[128,128], index: 3, kind: input, shape index: {}]   ;;  %s2924_s4 = inlined_call_operand.vmem [shape: bf16[128,256], index: 4, kind: input, shape index: {}]   ;;  %s2925_s5 = inlined_call_operand.vmem [shape: bf16[256,128], index: 5, kind: input, shape index: {}]   ;;  %s2926_s6 = inlined_call_operand.vmem [shape: f32[4,128], index: 6, kind: input, shape index: {}]   ;;  %s2927_s7 = inlined_call_operand.vmem [shape: bf16[2,64,128], index: 7, kind: output, shape index: {}]  }
   0x1   :  { %s2399_s26 = smov 0  }
   0x2 LB: > { %s29_s27 = sadd.s32 1, %s2348_s25  ;;  %p1878_p0 = scmp.ge.s32.totalorder %s2352_s26, 1  ;;  %s2352_s26 = sphi %s2399_s26, %s17_s26   ;;  %s2348_s25 = sphi %s2397_s25, %s2929_s25   ;;  %s2344_s24 = sphi %s2395_s24, %s2928_s24  }
   0x3   : > { %p31_p1 = scmp.ge.s32.totalorder %s29_s27, 2  ;;  %p268_p2 = scmp.lt.s32.totalorder %s2352_s26, 3 }
   0x5   : > { %s2931_s27 = smov (%p31_p1, %s29_s27), 0  ;;  %p269_p3 = pnand %p1878_p0, %p268_p2 }
   0x6   : > { %v2150_v0 = vld [vmem:[%s2922_s2 + $0x4] ss:$12 sps:$4 sm:$0xff] (!%p269_p3)   ;;  %p314_p4 = scmp.lt.s32.totalorder (!%p269_p3), %s2344_s24, 1  ;;  %v2152_v1 = vld [vmem:[%s2922_s2] ss:$12 sps:$4 sm:$0xff] (!%p269_p3)   ;;  %v2354_v2 = vmov (!%p269_p3), 0  }
   0x7   : > { %272 = sbr.rel (%p269_p3) target bundleno = 1536 (0x600), region = 48  ;;  %563 = vmatprep.mubr.bf16.mxu0 (!%p269_p3), %v2354_v2  ;;  %531 = vmatprep.subr.bf16.mxu0 (!%p269_p3), %v2150_v0  ;;  %v2153_v3 = vld [vmem:[%s2922_s2 + $0x1c] ss:$12 sps:$4 sm:$0xff] (!%p269_p3)   ;;  %v2155_v4 = vld [vmem:[%s2922_s2 + $0x18] ss:$12 sps:$4 sm:$0xff] (!%p269_p3)  }
   0x8   : > { %532 = vmatpush1.bf16.msra.mxu0 (!%p269_p3), %v2152_v1  ;;  %v2156_v5 = vld [vmem:[%s2922_s2 + $0x34] ss:$12 sps:$4 sm:$0xff] (!%p269_p3)   ;;  %v2158_v6 = vld [vmem:[%s2922_s2 + $0x30] ss:$12 sps:$4 sm:$0xff] (!%p269_p3)   ;;  %v2159_v7 = vld [vmem:[%s2922_s2 + $0x4c] ss:$12 sps:$4 sm:$0xff] (!%p269_p3)  }
   0x9   : > { %533 = vmatprep.subr.bf16.mxu0 (!%p269_p3), %v2153_v3  ;;  %v2161_v9 = vld [vmem:[%s2922_s2 + $0x48] ss:$12 sps:$4 sm:$0xff] (!%p269_p3)   ;;  %v2162_v10 = vld [vmem:[%s2922_s2 + $0x64] ss:$12 sps:$4 sm:$0xff] (!%p269_p3)   ;;  %v2164_v11 = vld [vmem:[%s2922_s2 + $0x60] ss:$12 sps:$4 sm:$0xff] (!%p269_p3)  }
   0xa   : > { %v2165_v12 = vld [vmem:[%s2922_s2 + $0x7c] ss:$12 sps:$4 sm:$0xff] (!%p269_p3)   ;;  %v2167_v13 = vld [vmem:[%s2922_s2 + $0x78] ss:$12 sps:$4 sm:$0xff] (!%p269_p3)   ;;  %v2168_v14 = vld [vmem:[%s2922_s2 + $0x94] ss:$12 sps:$4 sm:$0xff] (!%p269_p3)  }
   0xb   : > { %v2170_v15 = vld [vmem:[%s2922_s2 + $0x90] ss:$12 sps:$4 sm:$0xff] (!%p269_p3)   ;;  %v2171_v16 = vld [vmem:[%s2922_s2 + $0xac] ss:$12 sps:$4 sm:$0xff] (!%p269_p3)   ;;  %v2173_v17 = vld [vmem:[%s2922_s2 + $0xa8] ss:$12 sps:$4 sm:$0xff] (!%p269_p3)  }
   0xc   : > { %534 = vmatpush1.bf16.msra.mxu0 (!%p269_p3), %v2155_v4  ;;  %v2202_v37 = vld [vmem:[%s2922_s2 + $0x8] ss:$12 sps:$4 sm:$0xff] (!%p269_p3)   ;;  %v2203_v38 = vld [vmem:[%s2922_s2 + $0x20] ss:$12 sps:$4 sm:$0xff] (!%p269_p3)   ;;  %v2204_v39 = vld [vmem:[%s2922_s2 + $0x38] ss:$12 sps:$4 sm:$0xff] (!%p269_p3)  }
   0xd   : > { %535 = vmatprep.subr.bf16.mxu0 (!%p269_p3), %v2156_v5  ;;  %2077 = vmatprep.subr.bf16.mxu1 (!%p269_p3), %v2202_v37  ;;  %v2205_v40 = vld [vmem:[%s2922_s2 + $0x50] ss:$12 sps:$4 sm:$0xff] (!%p269_p3)   ;;  %v2206_v41 = vld [vmem:[%s2922_s2 + $0x68] ss:$12 sps:$4 sm:$0xff] (!%p269_p3)   ;;  %v2207_v42 = vld [vmem:[%s2922_s2 + $0x80] ss:$12 sps:$4 sm:$0xff] (!%p269_p3)  }
   0xe   : > { %s2933_s24 = smov (!%p314_p4, %s2344_s24), 1  ;;  %2078 = vmatpush3.bf16.msra.mxu1 %v2202_v37  ;;  %v2208_v43 = vld [vmem:[%s2922_s2 + $0x98] ss:$12 sps:$4 sm:$0xff]   ;;  %v2209_v44 = vld [vmem:[%s2922_s2 + $0xb0] ss:$12 sps:$4 sm:$0xff]  }
   0xf   : > { %s1979_s15 = sshll.u32 %s2933_s24, 5  ;;  %s1980_s23 = sshll.u32 %s2933_s24, 7  ;;  %2079 = vmatprep.subr.bf16.mxu1 %v2203_v38  ;;  %v2210_v45 = vld [vmem:[%s2923_s3] sm:$0xff]   ;;  %v2213_v37 = vld [vmem:[%s2923_s3 + $0x18] sm:$0xff]  }
  0x10   : > { %s2440_s20 = scalar_lea.vmem %s2920_s0, %s1979_s15  ;;  %536 = vmatpush1.bf16.msra.mxu0 %v2158_v6  ;;  %s2453_s9 = scalar_lea.vmem %s2921_s1, %s1980_s23 }
  0x11   : > { %v339_v8 = vld [vmem:[%s2440_s20] sm:$0xff]   ;;  %537 = vmatprep.subr.bf16.mxu0 %v2159_v7  ;;  %v2183_v20 = vld [vmem:[%s2453_s9 + $0x14] ss:$8 sps:$4 sm:$0xff]   ;;  %v2483_v21 = vld [vmem:[%s2440_s20 + $0x8] sm:$0xff]   ;;  %s2882_s30 = scalar_lea.vmem %s2927_s7, %s1979_s15 }
  0x12   : > { %2093 = vmatprep.mubr.bf16.mxu1 %v339_v8  ;;  %v2180_v18 = vld [vmem:[%s2453_s9 + $0x4] ss:$8 sps:$4 sm:$0xff]   ;;  %v2178_v19 = vld [vmem:[%s2453_s9] ss:$8 sps:$4 sm:$0xff]   ;;  %v2181_v22 = vld [vmem:[%s2453_s9 + $0x10] ss:$8 sps:$4 sm:$0xff]   ;;  %2080 = vmatpush3.bf16.msra.mxu1 %v2203_v38 }
  0x13   : > { %v2186_v23 = vld [vmem:[%s2453_s9 + $0x24] ss:$8 sps:$4 sm:$0xff]   ;;  %v2184_v24 = vld [vmem:[%s2453_s9 + $0x20] ss:$8 sps:$4 sm:$0xff]   ;;  %v2189_v25 = vld [vmem:[%s2453_s9 + $0x34] ss:$8 sps:$4 sm:$0xff]   ;;  %2081 = vmatprep.subr.bf16.mxu1 %v2204_v39 }
  0x14   : > { %538 = vmatpush1.bf16.msra.mxu0 %v2161_v9  ;;  %v343_v26 = vld [vmem:[%s2440_s20 + $0x10] sm:$0xff]   ;;  %v345_v28 = vld [vmem:[%s2440_s20 + $0x18] sm:$0xff]   ;;  %v2192_v29 = vld [vmem:[%s2453_s9 + $0x44] ss:$8 sps:$4 sm:$0xff]  }
  0x15   : > { %539 = vmatprep.subr.bf16.mxu0 %v2162_v10  ;;  %v2187_v27 = vld [vmem:[%s2453_s9 + $0x30] ss:$8 sps:$4 sm:$0xff]   ;;  %v2190_v30 = vld [vmem:[%s2453_s9 + $0x40] ss:$8 sps:$4 sm:$0xff]   ;;  %v2195_v31 = vld [vmem:[%s2453_s9 + $0x54] ss:$8 sps:$4 sm:$0xff]  }
  0x16   : > { %v2193_v32 = vld [vmem:[%s2453_s9 + $0x50] ss:$8 sps:$4 sm:$0xff]   ;;  %v2198_v33 = vld [vmem:[%s2453_s9 + $0x64] ss:$8 sps:$4 sm:$0xff]   ;;  %v2196_v34 = vld [vmem:[%s2453_s9 + $0x60] ss:$8 sps:$4 sm:$0xff]   ;;  %2082 = vmatpush3.bf16.msra.mxu1 %v2204_v39 }
  0x17   : > { %v2201_v35 = vld [vmem:[%s2453_s9 + $0x74] ss:$8 sps:$4 sm:$0xff]   ;;  %v2199_v36 = vld [vmem:[%s2453_s9 + $0x70] ss:$8 sps:$4 sm:$0xff]   ;;  %2083 = vmatprep.subr.bf16.mxu1 %v2205_v40  ;;  %v2214_v38 = vld [vmem:[%s2923_s3 + $0x20] sm:$0xff]  }
  0x18   : > { %540 = vmatpush1.bf16.msra.mxu0 %v2164_v11  ;;  %v2215_v39 = vld [vmem:[%s2923_s3 + $0x28] sm:$0xff]  }
  0x19   : > { %541 = vmatprep.subr.bf16.mxu0 %v2165_v12 }
  0x1a   : > { %2084 = vmatpush3.bf16.msra.mxu1 %v2205_v40  ;;  %v2216_v40 = vld [vmem:[%s2923_s3 + $0x30] sm:$0xff]  }
  0x1b   : > { %2085 = vmatprep.subr.bf16.mxu1 %v2206_v41 }
  0x1c   : > { %542 = vmatpush1.bf16.msra.mxu0 %v2167_v13 }
  0x1d   : > { %543 = vmatprep.subr.bf16.mxu0 %v2168_v14 }
  0x1e   : > { %2086 = vmatpush3.bf16.msra.mxu1 %v2206_v41  ;;  %v2217_v41 = vld [vmem:[%s2923_s3 + $0x38] sm:$0xff]  }
  0x1f   : > { %2087 = vmatprep.subr.bf16.mxu1 %v2207_v42 }
  0x20   : > { %544 = vmatpush1.bf16.msra.mxu0 %v2170_v15 }
  0x21   : > { %545 = vmatprep.subr.bf16.mxu0 %v2171_v16 }
  0x22   : > { %2088 = vmatpush3.bf16.msra.mxu1 %v2207_v42 }
  0x23   : > { %2089 = vmatprep.subr.bf16.mxu1 %v2208_v43 }
  0x24   : > { %546 = vmatpush1.bf16.msra.mxu0 %v2173_v17 }
  0x25   : > { %809 = vmatprep.subr.bf16.mxu0 %v2180_v18 }
  0x26   : > { %2090 = vmatpush3.bf16.msra.mxu1 %v2208_v43 }
  0x27   : > { %564 = vmatmul.mubr.bf16.vlgmr.msra.gmra.mrb[0].mxu0 %v339_v8  ;;  %2091 = vmatprep.subr.bf16.mxu1 %v2209_v44 }
  0x28   : > { %573 = vmatprep.mubr.bf16.mxu0 %v2354_v2  ;;  %810 = vmatpush1.bf16.msra.mxu0 %v2178_v19 }
  0x29   : > { %811 = vmatprep.subr.bf16.mxu0 %v2183_v20 }
  0x2a   : > { %2092 = vmatpush3.bf16.msra.mxu1 %v2209_v44 }
  0x2b   : > { %2101 = vmatprep.subr.bf16.mxu1 %v2210_v45 }
  0x2c   : > { %812 = vmatpush1.bf16.msra.mxu0 %v2181_v22 }
  0x2d   : > { %813 = vmatprep.subr.bf16.mxu0 %v2186_v23  ;;  %2094 = vmatmul.mubr.bf16.vlgmr.msra.gmra.mrb[0].mxu1 %v2483_v21 }
  0x2e   : > { %2102 = vmatpush3.bf16.msra.mxu1 %v2210_v45  ;;  %2097 = vmatprep.mubr.bf16.mxu1 %v343_v26 }
  0x2f   : > { %574 = vmatmul.mubr.bf16.gmra.mrb[4].mxu0 %v2483_v21 }
  0x30   : > { %583 = vmatprep.mubr.bf16.mxu0 %v2354_v2  ;;  %814 = vmatpush1.bf16.msra.mxu0 %v2184_v24 }
  0x31   : > { %815 = vmatprep.subr.bf16.mxu0 %v2189_v25 }
  0x34   : > { %816 = vmatpush1.bf16.msra.mxu0 %v2187_v27 }
  0x35   : > { %817 = vmatprep.subr.bf16.mxu0 %v2192_v29  ;;  %2098 = vmatmul.mubr.bf16.gmra.mrb[4].mxu1 %v345_v28 }
  0x37   : > { %584 = vmatmul.mubr.bf16.gmra.mrb[8].mxu0 %v343_v26 }
  0x38   : > { %593 = vmatprep.mubr.bf16.mxu0 %v2354_v2  ;;  %818 = vmatpush1.bf16.msra.mxu0 %v2190_v30 }
  0x39   : > { %819 = vmatprep.subr.bf16.mxu0 %v2195_v31 }
  0x3c   : > { %820 = vmatpush1.bf16.msra.mxu0 %v2193_v32 }
  0x3d   : > { %821 = vmatprep.subr.bf16.mxu0 %v2198_v33 }
  0x3f   : > { %594 = vmatmul.mubr.bf16.gmra.mrb[12].mxu0 %v345_v28 }
  0x40   : > { %841 = vmatprep.mubr.bf16.mxu0 %v2354_v2  ;;  %822 = vmatpush1.bf16.msra.mxu0 %v2196_v34 }
  0x41   : > { %823 = vmatprep.subr.bf16.mxu0 %v2201_v35  ;;  %v2211_v35 = vld [vmem:[%s2923_s3 + $0x8] sm:$0xff]  }
  0x42   : > { %2103 = vmatprep.subr.bf16.mxu1 %v2211_v35 }
  0x43   : > { %2104 = vmatpush3.bf16.msra.mxu1 %v2211_v35 }
  0x44   : > { %824 = vmatpush1.bf16.msra.mxu0 %v2199_v36  ;;  %v2212_v36 = vld [vmem:[%s2923_s3 + $0x10] sm:$0xff]  }
  0x45   : > { %2105 = vmatprep.subr.bf16.mxu1 %v2212_v36 }
  0x47   : > { %2106 = vmatpush3.bf16.msra.mxu1 %v2212_v36 }
  0x48   : > { %2107 = vmatprep.subr.bf16.mxu1 %v2213_v37 }
  0x4b   : > { %2108 = vmatpush3.bf16.msra.mxu1 %v2213_v37 }
  0x4c   : > { %2109 = vmatprep.subr.bf16.mxu1 %v2214_v38 }
  0x4f   : > { %2110 = vmatpush3.bf16.msra.mxu1 %v2214_v38 }
  0x50   : > { %2111 = vmatprep.subr.bf16.mxu1 %v2215_v39 }
  0x53   : > { %2112 = vmatpush3.bf16.msra.mxu1 %v2215_v39 }
  0x54   : > { %2113 = vmatprep.subr.bf16.mxu1 %v2216_v40 }
  0x57   : > { %2114 = vmatpush3.bf16.msra.mxu1 %v2216_v40 }
  0x58   : > { %2115 = vmatprep.subr.bf16.mxu1 %v2217_v41 }
  0x5b   : > { %2116 = vmatpush3.bf16.msra.mxu1 %v2217_v41 }
  0xfa   : > { %v565_v46 = vpop.f32.mrb[0].mxu0 }
  0xfb   : > { %v685_v47 = vmul.f32 1.442695, %v565_v46  ;;  %v2533_v48 = vpop.f32.mrb[1].mxu0  ;;  %v677_v59 = vadd.f32 1.0, %v565_v46  ;;  %vm669_vm0 = vcmp.gt.f32.partialorder %v565_v46, 0.0 }
  0xfc   : > { %v569_v49 = vpop.f32.mrb[2].mxu0 }
  0xfd   : > { %2262 = vpow2.f32 %v685_v47  ;;  %v687_v50 = vmul.f32 1.442695, %v569_v49  ;;  %v2535_v51 = vpop.f32.mrb[3].mxu0  ;;  %v678_v60 = vadd.f32 1.0, %v569_v49  ;;  %vm670_vm1 = vcmp.gt.f32.partialorder %v569_v49, 0.0 }
  0xff   : > { %2264 = vpow2.f32 %v687_v50 }
 0x100   : > { %v2574_v42 = vpop.f32.mrb[0].mxu1 }
 0x101   : > { %v2576_v43 = vpop.f32.mrb[1].mxu1 }
 0x102   : > { %v575_v52 = vpop.f32.mrb[4].mxu0  ;;  %v2578_v44 = vpop.f32.mrb[2].mxu1 }
 0x103   : > { %v689_v53 = vmul.f32 1.442695, %v575_v52  ;;  %v2537_v54 = vpop.f32.mrb[5].mxu0  ;;  %v679_v9 = vadd.f32 1.0, %v575_v52  ;;  %vm671_vm2 = vcmp.gt.f32.partialorder %v575_v52, 0.0  ;;  %v2580_v45 = vpop.f32.mrb[3].mxu1 }
 0x104   : > { %v579_v55 = vpop.f32.mrb[6].mxu0 }
 0x105   : > { %2266 = vpow2.f32 %v689_v53  ;;  %v691_v56 = vmul.f32 1.442695, %v579_v55  ;;  %v2539_v57 = vpop.f32.mrb[7].mxu0  ;;  %v680_v10 = vadd.f32 1.0, %v579_v55  ;;  %vm672_vm3 = vcmp.gt.f32.partialorder %v579_v55, 0.0 }
 0x107   : > { %v2263_v58 = vpop.eup %2262  ;;  %2268 = vpow2.f32 %v691_v56 }
 0x108   : > { %v701_v62 = vsel %vm669_vm0, %v677_v59, %v2263_v58  ;;  %v2582_v46 = vpop.f32.mrb[4].mxu1 }
 0x109   : > { %v2265_v61 = vpop.eup %2264  ;;  %v2584_v47 = vpop.f32.mrb[5].mxu1 }
 0x10a   : > { %v702_v63 = vsel %vm670_vm1, %v678_v60, %v2265_v61  ;;  %v585_v0 = vpop.f32.mrb[8].mxu0  ;;  %v2586_v49 = vpop.f32.mrb[6].mxu1 }
 0x10b   : > { %v709_v1 = vpack.c.bf16 %v702_v63, %v701_v62  ;;  %v693_v3 = vmul.f32 1.442695, %v585_v0  ;;  %v2541_v4 = vpop.f32.mrb[9].mxu0  ;;  %v681_v22 = vadd.f32 1.0, %v585_v0  ;;  %vm673_vm4 = vcmp.gt.f32.partialorder %v585_v0, 0.0  ;;  %v2588_v50 = vpop.f32.mrb[7].mxu1 }
 0x10c   : > { %v589_v5 = vpop.f32.mrb[10].mxu0 }
 0x10d   : > { %2270 = vpow2.f32 %v693_v3  ;;  %v695_v6 = vmul.f32 1.442695, %v589_v5  ;;  %v2543_v7 = vpop.f32.mrb[11].mxu0  ;;  %842 = vmatmul.mubr.bf16.vlgmr.msra.gmra.mrb[16].mxu0 %v709_v1  ;;  %v682_v23 = vadd.f32 1.0, %v589_v5  ;;  %vm674_vm5 = vcmp.gt.f32.partialorder %v589_v5, 0.0 }
 0x10e   : > { %851 = vmatprep.mubr.bf16.mxu0 %v2354_v2 }
 0x10f   : > { %v2267_v8 = vpop.eup %2266  ;;  %2272 = vpow2.f32 %v695_v6 }
 0x110   : > { %v703_v13 = vsel %vm671_vm2, %v679_v9, %v2267_v8 }
 0x111   : > { %v2269_v11 = vpop.eup %2268 }
 0x112   : > { %v595_v12 = vpop.f32.mrb[12].mxu0  ;;  %v704_v14 = vsel %vm672_vm3, %v680_v10, %v2269_v11 }
 0x113   : > { %v697_v15 = vmul.f32 1.442695, %v595_v12  ;;  %v2546_v16 = vpop.f32.mrb[13].mxu0  ;;  %v710_v17 = vpack.c.bf16 %v704_v14, %v703_v13  ;;  %v683_v29 = vadd.f32 1.0, %v595_v12  ;;  %vm675_vm6 = vcmp.gt.f32.partialorder %v595_v12, 0.0 }
 0x114   : > { %v599_v18 = vpop.f32.mrb[14].mxu0 }
 0x115   : > { %2274 = vpow2.f32 %v697_v15  ;;  %v699_v19 = vmul.f32 1.442695, %v599_v18  ;;  %v2548_v20 = vpop.f32.mrb[15].mxu0  ;;  %852 = vmatmul.mubr.bf16.gmra.mrb[20].mxu0 %v710_v17  ;;  %v684_v30 = vadd.f32 1.0, %v599_v18  ;;  %vm676_vm7 = vcmp.gt.f32.partialorder %v599_v18, 0.0 }
 0x116   : > { %861 = vmatprep.mubr.bf16.mxu0 %v2354_v2 }
 0x117   : > { %v2271_v21 = vpop.eup %2270  ;;  %2276 = vpow2.f32 %v699_v19 }
 0x118   : > { %v705_v25 = vsel %vm673_vm4, %v681_v22, %v2271_v21 }
 0x119   : > { %v2273_v24 = vpop.eup %2272 }
 0x11a   : > { %v706_v26 = vsel %vm674_vm5, %v682_v23, %v2273_v24 }
 0x11b   : > { %v711_v27 = vpack.c.bf16 %v706_v26, %v705_v25 }
 0x11d   : > { %862 = vmatmul.mubr.bf16.gmra.mrb[24].mxu0 %v711_v27 }
 0x11e   : > { %871 = vmatprep.mubr.bf16.mxu0 %v2354_v2 }
 0x11f   : > { %v2275_v28 = vpop.eup %2274 }
 0x120   : > { %v707_v32 = vsel %vm675_vm6, %v683_v29, %v2275_v28 }
 0x121   : > { %v2277_v31 = vpop.eup %2276 }
 0x122   : > { %v708_v33 = vsel %vm676_vm7, %v684_v30, %v2277_v31 }
 0x123   : > { %v712_v34 = vpack.c.bf16 %v708_v33, %v707_v32 }
 0x125   : > { %872 = vmatmul.mubr.bf16.gmra.mrb[28].mxu0 %v712_v34 }
 0x126   : > { %1309 = vmatprep.mubr.bf16.mxu0 %v2354_v2 }
 0x1e0   : > { %v843_v52 = vpop.f32.mrb[16].mxu0 }
 0x1e1   : > { %v845_v53 = vpop.f32.mrb[17].mxu0 }
 0x1e2   : > { %v882_v55 = vadd.f32 1.5625e-08, %v845_v53  ;;  %v847_v56 = vpop.f32.mrb[18].mxu0 }
 0x1e3   : > { %v849_v58 = vpop.f32.mrb[19].mxu0 }
 0x1e4   : > { %2278 = vrcp.f32 %v882_v55  ;;  %v883_v59 = vadd.f32 1.5625e-08, %v849_v58 }
 0x1e6   : > { %2280 = vrcp.f32 %v883_v59  ;;  %v2220_v59 = vld [vmem:[%s2924_s4 + $0x4] ss:$8 sps:$4 sm:$0xff]  }
 0x1e7   : > { %1277 = vmatprep.subr.bf16.mxu0 %v2220_v59 }
 0x1e8   : > { %v853_v60 = vpop.f32.mrb[20].mxu0 }
 0x1e9   : > { %v855_v61 = vpop.f32.mrb[21].mxu0 }
 0x1ea   : > { %v884_v62 = vadd.f32 1.5625e-08, %v855_v61  ;;  %v857_v63 = vpop.f32.mrb[22].mxu0  ;;  %v2218_v61 = vld [vmem:[%s2924_s4] ss:$8 sps:$4 sm:$0xff]  }
 0x1eb   : > { %v859_v0 = vpop.f32.mrb[23].mxu0  ;;  %1278 = vmatpush1.bf16.msra.mxu0 %v2218_v61 }
 0x1ec   : > { %2282 = vrcp.f32 %v884_v62  ;;  %v885_v1 = vadd.f32 1.5625e-08, %v859_v0 }
 0x1ee   : > { %v2279_v3 = vpop.eup %2278  ;;  %2284 = vrcp.f32 %v885_v1  ;;  %v2223_v1 = vld [vmem:[%s2924_s4 + $0x14] ss:$8 sps:$4 sm:$0xff]  }
 0x1ef   : > { %v898_v5 = vmul.f32 %v2279_v3, %v843_v52  ;;  %1279 = vmatprep.subr.bf16.mxu0 %v2223_v1 }
 0x1f0   : > { %v2281_v6 = vpop.eup %2280  ;;  %v863_v8 = vpop.f32.mrb[24].mxu0 }
 0x1f1   : > { %v865_v9 = vpop.f32.mrb[25].mxu0  ;;  %v899_v10 = vmul.f32 %v2281_v6, %v847_v56 }
 0x1f2   : > { %v886_v11 = vadd.f32 1.5625e-08, %v865_v9  ;;  %v867_v12 = vpop.f32.mrb[26].mxu0  ;;  %v2224_v9 = vld [vmem:[%s2924_s4 + $0x20] ss:$8 sps:$4 sm:$0xff]  }
 0x1f3   : > { %v869_v13 = vpop.f32.mrb[27].mxu0  ;;  %v906_v14 = vpack.c.bf16 %v899_v10, %v898_v5  ;;  %v2221_v5 = vld [vmem:[%s2924_s4 + $0x10] ss:$8 sps:$4 sm:$0xff]  }
 0x1f4   : > { %2286 = vrcp.f32 %v886_v11  ;;  %v887_v15 = vadd.f32 1.5625e-08, %v869_v13  ;;  %1280 = vmatpush1.bf16.msra.mxu0 %v2221_v5  ;;  %v2229_v11 = vld [vmem:[%s2924_s4 + $0x34] ss:$8 sps:$4 sm:$0xff]  }
 0x1f5   : > { %2117 = vmatprep.mubr.bf16.mxu1 %v906_v14  ;;  %v2232_v14 = vld [vmem:[%s2924_s4 + $0x44] ss:$8 sps:$4 sm:$0xff]  }
 0x1f6   : > { %v2283_v17 = vpop.eup %2282  ;;  %2288 = vrcp.f32 %v887_v15  ;;  %v2230_v15 = vld [vmem:[%s2924_s4 + $0x40] ss:$8 sps:$4 sm:$0xff]  }
 0x1f7   : > { %v900_v18 = vmul.f32 %v2283_v17, %v853_v60  ;;  %v2235_v17 = vld [vmem:[%s2924_s4 + $0x54] ss:$8 sps:$4 sm:$0xff]  }
 0x1f8   : > { %v2285_v19 = vpop.eup %2284  ;;  %v873_v21 = vpop.f32.mrb[28].mxu0 }
 0x1f9   : > { %v901_v22 = vmul.f32 %v2285_v19, %v857_v63  ;;  %v875_v23 = vpop.f32.mrb[29].mxu0  ;;  %v2238_v19 = vld [vmem:[%s2924_s4 + $0x64] ss:$8 sps:$4 sm:$0xff]  }
 0x1fa   : > { %v888_v24 = vadd.f32 1.5625e-08, %v875_v23  ;;  %v877_v25 = vpop.f32.mrb[30].mxu0  ;;  %v2239_v23 = vld [vmem:[%s2924_s4 + $0x70] ss:$8 sps:$4 sm:$0xff]  }
 0x1fb   : > { %v879_v26 = vpop.f32.mrb[31].mxu0  ;;  %v907_v27 = vpack.c.bf16 %v901_v22, %v900_v18  ;;  %v2233_v18 = vld [vmem:[%s2924_s4 + $0x50] ss:$8 sps:$4 sm:$0xff]   ;;  %v2241_v22 = vld [vmem:[%s2924_s4 + $0x74] ss:$8 sps:$4 sm:$0xff]  }
 0x1fc   : > { %2290 = vrcp.f32 %v888_v24  ;;  %v889_v28 = vadd.f32 1.5625e-08, %v879_v26  ;;  %v2242_v24 = vld [vmem:[%s2925_s5 + $0x40] sm:$0xff]   ;;  %v2244_v26 = vld [vmem:[%s2925_s5 + $0x48] sm:$0xff]  }
 0x1fd   : > { %2118 = vmatmul.mubr.bf16.vlgmr.msra.gmra.mrb[8].mxu1 %v907_v27  ;;  %2037 = vmatprep.subr.bf16.mxu1 %v2242_v24  ;;  %v2245_v27 = vld [vmem:[%s2925_s5 + $0x8] sm:$0xff]  }
 0x1fe   : > { %v2287_v29 = vpop.eup %2286  ;;  %2292 = vrcp.f32 %v889_v28  ;;  %v2246_v28 = vld [vmem:[%s2925_s5 + $0x50] sm:$0xff]  }
 0x1ff   : > { %v902_v30 = vmul.f32 %v2287_v29, %v863_v8  ;;  %v2226_v8 = vld [vmem:[%s2924_s4 + $0x24] ss:$8 sps:$4 sm:$0xff]   ;;  %v2247_v29 = vld [vmem:[%s2925_s5 + $0x10] sm:$0xff]  }
 0x200   : > { %v2289_v31 = vpop.eup %2288  ;;  %1281 = vmatprep.subr.bf16.mxu0 %v2226_v8 }
 0x201   : > { %v903_v32 = vmul.f32 %v2289_v31, %v867_v12  ;;  %1282 = vmatpush1.bf16.msra.mxu0 %v2224_v9  ;;  %v2227_v12 = vld [vmem:[%s2924_s4 + $0x30] ss:$8 sps:$4 sm:$0xff]  }
 0x202   : > { %1283 = vmatprep.subr.bf16.mxu0 %v2229_v11  ;;  %v2249_v31 = vld [vmem:[%s2925_s5 + $0x18] sm:$0xff]   ;;  %v1153_v11 = vlaneseq }
 0x203   : > { %v908_v33 = vpack.c.bf16 %v903_v32, %v902_v30  ;;  %v2248_v30 = vld [vmem:[%s2925_s5 + $0x58] sm:$0xff]   ;;  %v2250_v32 = vld [vmem:[%s2925_s5 + $0x60] sm:$0xff]  }
 0x205   : > { %2121 = vmatprep.mubr.bf16.mxu1 %v908_v33  ;;  %1284 = vmatpush1.bf16.msra.mxu0 %v2227_v12  ;;  %v2251_v33 = vld [vmem:[%s2925_s5 + $0x20] sm:$0xff]  }
 0x206   : > { %v2291_v34 = vpop.eup %2290  ;;  %1285 = vmatprep.subr.bf16.mxu0 %v2232_v14 }
 0x207   : > { %v904_v35 = vmul.f32 %v2291_v34, %v873_v21  ;;  %v2236_v21 = vld [vmem:[%s2924_s4 + $0x60] ss:$8 sps:$4 sm:$0xff]  }
 0x208   : > { %v2293_v36 = vpop.eup %2292  ;;  %v2252_v34 = vld [vmem:[%s2925_s5 + $0x68] sm:$0xff]  }
 0x209   : > { %v905_v37 = vmul.f32 %v2293_v36, %v877_v25  ;;  %1286 = vmatpush1.bf16.msra.mxu0 %v2230_v15  ;;  %v2243_v25 = vld [vmem:[%s2925_s5] sm:$0xff]  }
 0x20a   : > { %1287 = vmatprep.subr.bf16.mxu0 %v2235_v17  ;;  %2038 = vmatpush3.bf16.msra.mxu1 %v2243_v25 }
 0x20b   : > { %v909_v38 = vpack.c.bf16 %v905_v37, %v904_v35  ;;  %2039 = vmatprep.subr.bf16.mxu1 %v2244_v26 }
 0x20d   : > { %2122 = vmatmul.mubr.bf16.gmra.mrb[12].mxu1 %v909_v38  ;;  %1288 = vmatpush1.bf16.msra.mxu0 %v2233_v18 }
 0x20e   : > { %1289 = vmatprep.subr.bf16.mxu0 %v2238_v19  ;;  %2040 = vmatpush3.bf16.msra.mxu1 %v2245_v27 }
 0x20f   : > { %2041 = vmatprep.subr.bf16.mxu1 %v2246_v28 }
 0x211   : > { %1290 = vmatpush1.bf16.msra.mxu0 %v2236_v21  ;;  %v2717_v21 = vshrl.u32 %v1153_v11, 7 }
 0x212   : > { %1291 = vmatprep.subr.bf16.mxu0 %v2241_v22  ;;  %2042 = vmatpush3.bf16.msra.mxu1 %v2247_v29 }
 0x213   : > { %2043 = vmatprep.subr.bf16.mxu1 %v2248_v30  ;;  %v1155_v30 = vsub.s32 0, %v2717_v21 }
 0x215   : > { %1292 = vmatpush1.bf16.msra.mxu0 %v2239_v23 }
 0x216   : > { %2044 = vmatpush3.bf16.msra.mxu1 %v2249_v31 }
 0x217   : > { %2045 = vmatprep.subr.bf16.mxu1 %v2250_v32 }
 0x21a   : > { %2046 = vmatpush3.bf16.msra.mxu1 %v2251_v33  ;;  %v2727_v33 = vld [vmem:[%s2926_s6] sm:$0xf] }
 0x21b   : > { %2047 = vmatprep.subr.bf16.mxu1 %v2252_v34 }
 0x2d0   : > { %v2590_v39 = vpop.f32.mrb[8].mxu1 }
 0x2d1   : > { %v2592_v40 = vpop.f32.mrb[9].mxu1  ;;  %v1067_v56 = vmul.f32 %v2590_v39, %v2590_v39 }
 0x2d2   : > { %1040 = vadd.xlane.f32.xlu0 %v2592_v40  ;;  %v2595_v41 = vpop.f32.mrb[10].mxu1  ;;  %v1065_v52 = vmul.f32 %v2592_v40, %v2592_v40 }
 0x2d3   : > { %v2599_v53 = vpop.f32.mrb[11].mxu1  ;;  %v1068_v58 = vmul.f32 %v2595_v41, %v2595_v41 }
 0x2d4   : > { %1073 = vadd.xlane.f32.xlu1 %v1065_v52  ;;  %v1066_v55 = vmul.f32 %v2599_v53, %v2599_v53 }
 0x2d6   : > { %1042 = vadd.xlane.f32.xlu0 %v2599_v53 }
 0x2d8   : > { %1075 = vadd.xlane.f32.xlu1 %v1066_v55 }
 0x2da   : > { %1044 = vadd.xlane.f32.xlu0 %v2590_v39 }
 0x2dc   : > { %1046 = vadd.xlane.f32.xlu1 %v2595_v41 }
 0x2de   : > { %1077 = vadd.xlane.f32.xlu0 %v1067_v56 }
 0x2e0   : > { %1079 = vadd.xlane.f32.xlu1 %v1068_v58  ;;  %v2613_v60 = vpop.f32.mrb[12].mxu1 }
 0x2e1   : > { %v2618_v62 = vpop.f32.mrb[13].mxu1  ;;  %v1071_v10 = vmul.f32 %v2613_v60, %v2613_v60 }
 0x2e2   : > { %1048 = vadd.xlane.f32.xlu0 %v2618_v62  ;;  %v2621_v63 = vpop.f32.mrb[14].mxu1  ;;  %v1069_v3 = vmul.f32 %v2618_v62, %v2618_v62 }
 0x2e3   : > { %v2623_v0 = vpop.f32.mrb[15].mxu1  ;;  %v1072_v13 = vmul.f32 %v2621_v63, %v2621_v63 }
 0x2e4   : > { %1050 = vadd.xlane.f32.xlu1 %v2623_v0  ;;  %v1070_v6 = vmul.f32 %v2623_v0, %v2623_v0 }
 0x2e6   : > { %1081 = vadd.xlane.f32.xlu0 %v1069_v3 }
 0x2e8   : > { %1083 = vadd.xlane.f32.xlu1 %v1070_v6 }
 0x2ea   : > { %1052 = vadd.xlane.f32.xlu0 %v2613_v60 }
 0x2ec   : > { %1054 = vadd.xlane.f32.xlu1 %v2621_v63 }
 0x2ee   : > { %1085 = vadd.xlane.f32.xlu0 %v1071_v10 }
 0x2f0   : > { %1087 = vadd.xlane.f32.xlu1 %v1072_v13 }
 0x35f   : > { %v1041_v35 = vpop.xlane.xlu0 %1040 }
 0x360   : > { %v1057_v36 = vmul.f32 0.0078125, %v1041_v35 }
 0x361   : > { %v1074_v37 = vpop.xlane.xlu1 %1073 }
 0x362   : > { %v1097_v38 = vmul.f32 %v1057_v36, %v1057_v36  ;;  %v1089_v52 = vmul.f32 0.0078125, %v1074_v37  ;;  %v1121_v34 = vsub.f32 %v2592_v40, %v1057_v36 }
 0x363   : > { %v1043_v55 = vpop.xlane.xlu0 %1042 }
 0x364   : > { %v1105_v56 = vsub.f32 %v1089_v52, %v1097_v38  ;;  %v1058_v58 = vmul.f32 0.0078125, %v1043_v55 }
 0x365   : > { %v1076_v59 = vpop.xlane.xlu1 %1075 }
 0x366   : > { %v1113_v61 = vmax.f32 %v1105_v56, 0.0  ;;  %v1098_v1 = vmul.f32 %v1058_v58, %v1058_v58  ;;  %v1090_v3 = vmul.f32 0.0078125, %v1076_v59 }
 0x367   : > { %v1045_v5 = vpop.xlane.xlu0 %1044 }
 0x368   : > { %v1129_v6 = vadd.f32 1e-05, %v1113_v61  ;;  %v1106_v8 = vsub.f32 %v1090_v3, %v1098_v1  ;;  %v2711_v9 = vmul.f32 0.0078125, %v1045_v5  ;;  %v2735_v1 = vrot.slane %v2727_v33, %v1155_v30 }
 0x369   : > { %v1047_v10 = vpop.xlane.xlu1 %1046  ;;  %v1167_v3 = vsub.s32 1, %v2717_v21 }
 0x36a   : > { %2294 = vrsqrt.f32 %v1129_v6  ;;  %v1114_v12 = vmax.f32 %v1106_v8, 0.0  ;;  %v2713_v13 = vmul.f32 0.0078125, %v1047_v10  ;;  %v1099_v17 = vmul.f32 %v2711_v9, %v2711_v9 }
 0x36b   : > { %v1078_v14 = vpop.xlane.xlu0 %1077  ;;  %v1122_v6 = vsub.f32 %v2599_v53, %v1058_v58 }
 0x36c   : > { %v1130_v15 = vadd.f32 1e-05, %v1114_v12  ;;  %v1091_v18 = vmul.f32 0.0078125, %v1078_v14  ;;  %v1100_v22 = vmul.f32 %v2713_v13, %v2713_v13 }
 0x36d   : > { %v1080_v19 = vpop.xlane.xlu1 %1079 }
 0x36e   : > { %2296 = vrsqrt.f32 %v1130_v15  ;;  %v1107_v23 = vsub.f32 %v1091_v18, %v1099_v17  ;;  %v1092_v24 = vmul.f32 0.0078125, %v1080_v19  ;;  %v1168_v19 = vrot.slane %v2727_v33, %v1167_v3 }
 0x36f   : > { %v1049_v25 = vpop.xlane.xlu0 %1048 }
 0x370   : > { %v1115_v26 = vmax.f32 %v1107_v23, 0.0  ;;  %v1108_v27 = vsub.f32 %v1092_v24, %v1100_v22  ;;  %v2721_v28 = vmul.f32 0.0078125, %v1049_v25 }
 0x371   : > { %v1051_v29 = vpop.xlane.xlu1 %1050 }
 0x372   : > { %v1131_v31 = vadd.f32 1e-05, %v1115_v26  ;;  %v1116_v32 = vmax.f32 %v1108_v27, 0.0  ;;  %v2730_v35 = vmul.f32 0.0078125, %v1051_v29  ;;  %v1101_v55 = vmul.f32 %v2721_v28, %v2721_v28 }
 0x373   : > { %v1082_v37 = vpop.xlane.xlu0 %1081  ;;  %v1123_v29 = vsub.f32 %v2590_v39, %v2711_v9 }
 0x374   : > { %v2295_v38 = vpop.eup %2294  ;;  %2298 = vrsqrt.f32 %v1131_v31  ;;  %v1132_v52 = vadd.f32 1e-05, %v1116_v32  ;;  %v1093_v56 = vmul.f32 0.0078125, %v1082_v37  ;;  %v1102_v40 = vmul.f32 %v2730_v35, %v2730_v35 }
 0x375   : > { %v1145_v59 = vmul.f32 %v2295_v38, %v1121_v34  ;;  %v1084_v61 = vpop.xlane.xlu1 %1083 }
 0x376   : > { %2300 = vrsqrt.f32 %v1132_v52  ;;  %v1109_v36 = vsub.f32 %v1093_v56, %v1101_v55  ;;  %v1094_v5 = vmul.f32 0.0078125, %v1084_v61  ;;  %v1124_v55 = vsub.f32 %v2595_v41, %v2713_v13 }
 0x377   : > { %v1053_v8 = vpop.xlane.xlu0 %1052  ;;  %v1157_v18 = vmul.f32 %v2735_v1, %v1145_v59  ;;  %v1125_v41 = vsub.f32 %v2618_v62, %v2721_v28 }
 0x378   : > { %v2297_v10 = vpop.eup %2296  ;;  %v1117_v11 = vmax.f32 %v1109_v36, 0.0  ;;  %v1110_v12 = vsub.f32 %v1094_v5, %v1102_v40  ;;  %v1063_v14 = vmul.f32 0.0078125, %v1053_v8 }
 0x379   : > { %v1146_v15 = vmul.f32 %v2297_v10, %v1122_v6  ;;  %v1055_v17 = vpop.xlane.xlu1 %1054  ;;  %v1169_v31 = vadd.f32 %v1168_v19, %v1157_v18 }
 0x37a   : > { %v1133_v22 = vadd.f32 1e-05, %v1117_v11  ;;  %v1118_v23 = vmax.f32 %v1110_v12, 0.0  ;;  %v1064_v24 = vmul.f32 0.0078125, %v1055_v17  ;;  %v1103_v53 = vmul.f32 %v1063_v14, %v1063_v14 }
 0x37b   : > { %v1086_v25 = vpop.xlane.xlu0 %1085  ;;  %v1158_v26 = vmul.f32 %v2735_v1, %v1146_v15  ;;  %v1126_v12 = vsub.f32 %v2623_v0, %v2730_v35  ;;  %v1127_v62 = vsub.f32 %v2613_v60, %v1063_v14  ;;  %v2253_v60 = vld [vmem:[%s2925_s5 + $0x28] sm:$0xff]   ;;  %v2255_v14 = vld [vmem:[%s2925_s5 + $0x30] sm:$0xff]  }
 0x37c   : > { %2302 = vrsqrt.f32 %v1133_v22  ;;  %v1134_v27 = vadd.f32 1e-05, %v1118_v23  ;;  %v1095_v58 = vmul.f32 0.0078125, %v1086_v25  ;;  %v1104_v37 = vmul.f32 %v1064_v24, %v1064_v24  ;;  %2048 = vmatpush3.bf16.msra.mxu1 %v2253_v60 }
 0x37d   : > { %v1088_v30 = vpop.xlane.xlu1 %1087  ;;  %v1170_v32 = vadd.f32 %v1168_v19, %v1158_v26 }
 0x37e   : > { %v2299_v34 = vpop.eup %2298  ;;  %2304 = vrsqrt.f32 %v1134_v27  ;;  %v1111_v38 = vsub.f32 %v1095_v58, %v1103_v53  ;;  %v1096_v52 = vmul.f32 0.0078125, %v1088_v30  ;;  %v1128_v53 = vsub.f32 %v2621_v63, %v1064_v24  ;;  %v2254_v63 = vld [vmem:[%s2925_s5 + $0x70] sm:$0xff]  }
 0x37f   : > { %v1177_v56 = vpack.c.bf16 %v1170_v32, %v1169_v31  ;;  %v1147_v59 = vmul.f32 %v2299_v34, %v1123_v29  ;;  %2049 = vmatprep.subr.bf16.mxu1 %v2254_v63 }
 0x380   : > { %v2301_v61 = vpop.eup %2300  ;;  %v1119_v3 = vmax.f32 %v1111_v38, 0.0  ;;  %v1112_v40 = vsub.f32 %v1096_v52, %v1104_v37  ;;  %2050 = vmatpush3.bf16.msra.mxu1 %v2255_v14 }
 0x381   : > { %1310 = vmatmul.mubr.bf16.vlgmr.msra.gmra.mrb[32].mxu0 %v1177_v56  ;;  %v1148_v36 = vmul.f32 %v2301_v61, %v1124_v55  ;;  %v1159_v39 = vmul.f32 %v2735_v1, %v1147_v59 }
 0x382   : > { %v1135_v9 = vadd.f32 1e-05, %v1119_v3  ;;  %v1120_v5 = vmax.f32 %v1112_v40, 0.0  ;;  %1319 = vmatprep.mubr.bf16.mxu0 %v2354_v2 }
 0x383   : > { %v1160_v6 = vmul.f32 %v2735_v1, %v1148_v36  ;;  %v1171_v13 = vadd.f32 %v1168_v19, %v1159_v39 }
 0x384   : > { %2306 = vrsqrt.f32 %v1135_v9  ;;  %v1136_v8 = vadd.f32 1e-05, %v1120_v5 }
 0x385   : > { %v1172_v10 = vadd.f32 %v1168_v19, %v1160_v6 }
 0x386   : > { %v2303_v11 = vpop.eup %2302  ;;  %2308 = vrsqrt.f32 %v1136_v8 }
 0x387   : > { %v1178_v15 = vpack.c.bf16 %v1172_v10, %v1171_v13  ;;  %v1149_v17 = vmul.f32 %v2303_v11, %v1125_v41 }
 0x388   : > { %v2305_v18 = vpop.eup %2304 }
 0x389   : > { %1320 = vmatmul.mubr.bf16.gmra.mrb[36].mxu0 %v1178_v15  ;;  %v1150_v22 = vmul.f32 %v2305_v18, %v1126_v12  ;;  %v1161_v23 = vmul.f32 %v2735_v1, %v1149_v17 }
 0x38a   : > { %1329 = vmatprep.mubr.bf16.mxu0 %v2354_v2 }
 0x38b   : > { %v1162_v25 = vmul.f32 %v2735_v1, %v1150_v22  ;;  %v1173_v28 = vadd.f32 %v1168_v19, %v1161_v23 }
 0x38d   : > { %v1174_v26 = vadd.f32 %v1168_v19, %v1162_v25 }
 0x38e   : > { %v2307_v27 = vpop.eup %2306 }
 0x38f   : > { %v1179_v58 = vpack.c.bf16 %v1174_v26, %v1173_v28  ;;  %v1151_v0 = vmul.f32 %v2307_v27, %v1127_v62 }
 0x390   : > { %v2309_v35 = vpop.eup %2308 }
 0x391   : > { %1330 = vmatmul.mubr.bf16.gmra.mrb[40].mxu0 %v1179_v58  ;;  %v1152_v29 = vmul.f32 %v2309_v35, %v1128_v53  ;;  %v1163_v30 = vmul.f32 %v2735_v1, %v1151_v0 }
 0x392   : > { %1339 = vmatprep.mubr.bf16.mxu0 %v2354_v2  ;;  %v2256_v2 = vld [vmem:[%s2925_s5 + $0x78] sm:$0xff]  }
 0x393   : > { %v1164_v31 = vmul.f32 %v2735_v1, %v1152_v29  ;;  %v1175_v32 = vadd.f32 %v1168_v19, %v1163_v30  ;;  %v2257_v1 = vld [vmem:[%s2925_s5 + $0x38] sm:$0xff]   ;;  %2051 = vmatprep.subr.bf16.mxu1 %v2256_v2 }
 0x394   : > { %2052 = vmatpush3.bf16.msra.mxu1 %v2257_v1 }
 0x395   : > { %v1176_v34 = vadd.f32 %v1168_v19, %v1164_v31 }
 0x397   : > { %v1180_v37 = vpack.c.bf16 %v1176_v34, %v1175_v32 }
 0x399   : > { %1340 = vmatmul.mubr.bf16.gmra.mrb[44].mxu0 %v1180_v37 }
 0x454   : > { %v1311_v19 = vpop.f32.mrb[32].mxu0 }
 0x455   : > { %v1350_v24 = vadd.f32 %v1311_v19, %v2533_v48  ;;  %v1313_v38 = vpop.f32.mrb[33].mxu0 }
 0x456   : > { %v1351_v52 = vadd.f32 %v1313_v38, %v2576_v43  ;;  %v1315_v55 = vpop.f32.mrb[34].mxu0 }
 0x457   : > { %v1352_v56 = vadd.f32 %v1315_v55, %v2535_v51  ;;  %v1317_v59 = vpop.f32.mrb[35].mxu0  ;;  %v1366_v3 = vmax.f32 %v1350_v24, 0.0 }
 0x458   : > { %v1353_v61 = vadd.f32 %v1317_v59, %v2580_v45  ;;  %v1367_v36 = vmax.f32 %v1351_v52, 0.0 }
 0x459   : > { %v1368_v40 = vmax.f32 %v1352_v56, 0.0 }
 0x45a   : > { %v1369_v39 = vmax.f32 %v1353_v61, 0.0 }
 0x45b   : > { %v1382_v9 = vpack.c.bf16 %v1368_v40, %v1366_v3 }
 0x45c   : > { %v1383_v5 = vpack.c.bf16 %v1369_v39, %v1367_v36  ;;  %v1321_v6 = vpop.f32.mrb[36].mxu0 }
 0x45d   : > { %v1354_v8 = vadd.f32 %v1321_v6, %v2537_v54  ;;  %v1323_v41 = vpop.f32.mrb[37].mxu0 }
 0x45e   : > { %v1355_v48 = vadd.f32 %v2574_v42, %v1323_v41  ;;  %v1325_v13 = vpop.f32.mrb[38].mxu0  ;;  %1550 = vmatprep.mubr.bf16.mxu1 %v1383_v5 }
 0x45f   : > { %v1356_v43 = vadd.f32 %v1325_v13, %v2539_v57  ;;  %v1327_v51 = vpop.f32.mrb[39].mxu0  ;;  %1551 = vmatmul.mubr.bf16.vlgmr.msra.gmra.mrb[16].mxu1 %v1382_v9  ;;  %v1370_v10 = vmax.f32 %v1354_v8, 0.0 }
 0x460   : > { %v1357_v45 = vadd.f32 %v2578_v44, %v1327_v51  ;;  %v1371_v12 = vmax.f32 %v1355_v48, 0.0 }
 0x461   : > { %v1372_v11 = vmax.f32 %v1356_v43, 0.0 }
 0x462   : > { %v1373_v15 = vmax.f32 %v1357_v45, 0.0 }
 0x463   : > { %v1384_v17 = vpack.c.bf16 %v1372_v11, %v1370_v10 }
 0x464   : > { %v1385_v18 = vpack.c.bf16 %v1373_v15, %v1371_v12  ;;  %v1331_v22 = vpop.f32.mrb[40].mxu0 }
 0x465   : > { %v1358_v54 = vadd.f32 %v1331_v22, %v2541_v4  ;;  %v1333_v23 = vpop.f32.mrb[41].mxu0 }
 0x466   : > { %v1359_v42 = vadd.f32 %v1333_v23, %v2584_v47  ;;  %v1335_v25 = vpop.f32.mrb[42].mxu0  ;;  %1558 = vmatprep.mubr.bf16.mxu1 %v1385_v18 }
 0x467   : > { %v1360_v57 = vadd.f32 %v1335_v25, %v2543_v7  ;;  %v1337_v62 = vpop.f32.mrb[43].mxu0  ;;  %1559 = vmatmul.mubr.bf16.gmra.mrb[20].mxu1 %v1384_v17  ;;  %v1374_v28 = vmax.f32 %v1358_v54, 0.0 }
 0x468   : > { %v1361_v44 = vadd.f32 %v1337_v62, %v2588_v50  ;;  %v1375_v27 = vmax.f32 %v1359_v42, 0.0 }
 0x469   : > { %v1376_v26 = vmax.f32 %v1360_v57, 0.0 }
 0x46a   : > { %v1377_v53 = vmax.f32 %v1361_v44, 0.0 }
 0x46b   : > { %v1386_v58 = vpack.c.bf16 %v1376_v26, %v1374_v28 }
 0x46c   : > { %v1387_v0 = vpack.c.bf16 %v1377_v53, %v1375_v27  ;;  %v1341_v35 = vpop.f32.mrb[44].mxu0 }
 0x46d   : > { %v1362_v4 = vadd.f32 %v1341_v35, %v2546_v16  ;;  %v1343_v29 = vpop.f32.mrb[45].mxu0 }
 0x46e   : > { %v1363_v47 = vadd.f32 %v2582_v46, %v1343_v29  ;;  %v1345_v30 = vpop.f32.mrb[46].mxu0  ;;  %1566 = vmatprep.mubr.bf16.mxu1 %v1387_v0 }
 0x46f   : > { %v1364_v7 = vadd.f32 %v1345_v30, %v2548_v20  ;;  %v1347_v31 = vpop.f32.mrb[47].mxu0  ;;  %1567 = vmatmul.mubr.bf16.gmra.mrb[24].mxu1 %v1386_v58  ;;  %v1378_v32 = vmax.f32 %v1362_v4, 0.0 }
 0x470   : > { %v1365_v50 = vadd.f32 %v2586_v49, %v1347_v31  ;;  %v1379_v37 = vmax.f32 %v1363_v47, 0.0 }
 0x471   : > { %v1380_v34 = vmax.f32 %v1364_v7, 0.0 }
 0x472   : > { %v1381_v60 = vmax.f32 %v1365_v50, 0.0 }
 0x473   : > { %v1388_v63 = vpack.c.bf16 %v1380_v34, %v1378_v32 }
 0x474   : > { %v1389_v14 = vpack.c.bf16 %v1381_v60, %v1379_v37 }
 0x476   : > { %1574 = vmatprep.mubr.bf16.mxu1 %v1389_v14 }
 0x477   : > { %1575 = vmatmul.mubr.bf16.gmra.mrb[28].mxu1 %v1388_v63 }
 0x532   : > { %v2053_v16 = vpop.f32.mrb[16].mxu1 }
 0x533   : > { %v2054_v2 = vpop.f32.mrb[17].mxu1 }
 0x534   : > { %v2794_v1 = vadd.f32 %v2054_v2, %v2053_v16  ;;  %v2056_v46 = vpop.f32.mrb[18].mxu1  ;;  %v1697_v2 = vsub.s32 2, %v2717_v21 }
 0x535   : > { %v2057_v19 = vpop.f32.mrb[19].mxu1 }
 0x536   : > { %v2796_v24 = vadd.f32 %v2057_v19, %v2056_v46  ;;  %1583 = vadd.xlane.f32.xlu0 %v2794_v1  ;;  %v1607_v20 = vmul.f32 %v2794_v1, %v2794_v1 }
 0x538   : > { %1585 = vadd.xlane.f32.xlu1 %v2796_v24  ;;  %v1608_v38 = vmul.f32 %v2796_v24, %v2796_v24 }
 0x53a   : > { %v2059_v49 = vpop.f32.mrb[20].mxu1  ;;  %1615 = vadd.xlane.f32.xlu0 %v1607_v20 }
 0x53b   : > { %v2060_v52 = vpop.f32.mrb[21].mxu1 }
 0x53c   : > { %v2804_v55 = vadd.f32 %v2060_v52, %v2059_v49  ;;  %v2062_v56 = vpop.f32.mrb[22].mxu1  ;;  %1617 = vadd.xlane.f32.xlu1 %v1608_v38  ;;  %v1709_v49 = vsub.s32 3, %v2717_v21 }
 0x53d   : > { %v2063_v59 = vpop.f32.mrb[23].mxu1 }
 0x53e   : > { %v2806_v61 = vadd.f32 %v2063_v59, %v2062_v56  ;;  %1587 = vadd.xlane.f32.xlu0 %v2804_v55  ;;  %v1609_v3 = vmul.f32 %v2804_v55, %v2804_v55 }
 0x540   : > { %1589 = vadd.xlane.f32.xlu1 %v2806_v61  ;;  %v1610_v36 = vmul.f32 %v2806_v61, %v2806_v61 }
 0x542   : > { %1619 = vadd.xlane.f32.xlu0 %v1609_v3  ;;  %v2065_v40 = vpop.f32.mrb[24].mxu1 }
 0x543   : > { %v2066_v39 = vpop.f32.mrb[25].mxu1 }
 0x544   : > { %v2814_v9 = vadd.f32 %v2066_v39, %v2065_v40  ;;  %1621 = vadd.xlane.f32.xlu1 %v1610_v36  ;;  %v2068_v5 = vpop.f32.mrb[26].mxu1  ;;  %v2852_v36 = vrot.slane %v2727_v33, %v1697_v2 }
 0x545   : > { %v2069_v6 = vpop.f32.mrb[27].mxu1 }
 0x546   : > { %v2816_v8 = vadd.f32 %v2069_v6, %v2068_v5  ;;  %1591 = vadd.xlane.f32.xlu0 %v2814_v9  ;;  %v1611_v41 = vmul.f32 %v2814_v9, %v2814_v9 }
 0x548   : > { %1593 = vadd.xlane.f32.xlu1 %v2816_v8  ;;  %v1612_v13 = vmul.f32 %v2816_v8, %v2816_v8 }
 0x54a   : > { %1623 = vadd.xlane.f32.xlu0 %v1611_v41  ;;  %v2071_v48 = vpop.f32.mrb[28].mxu1 }
 0x54b   : > { %v2072_v43 = vpop.f32.mrb[29].mxu1 }
 0x54c   : > { %v2824_v51 = vadd.f32 %v2072_v43, %v2071_v48  ;;  %1625 = vadd.xlane.f32.xlu1 %v1612_v13  ;;  %v2074_v45 = vpop.f32.mrb[30].mxu1  ;;  %v2858_v13 = vrot.slane %v2727_v33, %v1709_v49 }
 0x54d   : > { %v2075_v10 = vpop.f32.mrb[31].mxu1 }
 0x54e   : > { %v2826_v11 = vadd.f32 %v2075_v10, %v2074_v45  ;;  %1595 = vadd.xlane.f32.xlu0 %v2824_v51  ;;  %v1613_v12 = vmul.f32 %v2824_v51, %v2824_v51 }
 0x550   : > { %1597 = vadd.xlane.f32.xlu1 %v2826_v11  ;;  %v1614_v15 = vmul.f32 %v2826_v11, %v2826_v11 }
 0x552   : > { %1627 = vadd.xlane.f32.xlu0 %v1613_v12 }
 0x554   : > { %1629 = vadd.xlane.f32.xlu1 %v1614_v15 }
 0x5c3   : > { %v1584_v17 = vpop.xlane.xlu0 %1583 }
 0x5c4   : > { %v1599_v18 = vmul.f32 0.0078125, %v1584_v17 }
 0x5c5   : > { %v1586_v22 = vpop.xlane.xlu1 %1585 }
 0x5c6   : > { %v1600_v54 = vmul.f32 0.0078125, %v1586_v22  ;;  %v1639_v42 = vmul.f32 %v1599_v18, %v1599_v18  ;;  %v1663_v40 = vsub.f32 %v2794_v1, %v1599_v18 }
 0x5c7   : > { %v1616_v23 = vpop.xlane.xlu0 %1615 }
 0x5c8   : > { %v1631_v25 = vmul.f32 0.0078125, %v1616_v23  ;;  %v1640_v62 = vmul.f32 %v1600_v54, %v1600_v54  ;;  %v1664_v48 = vsub.f32 %v2796_v24, %v1600_v54  ;;  %v2326_v23 = vld [vmem:[%s2440_s20] sm:$0xff]  }
 0x5c9   : > { %v1618_v57 = vpop.xlane.xlu1 %1617 }
 0x5ca   : > { %v1647_v44 = vsub.f32 %v1631_v25, %v1639_v42  ;;  %v1632_v28 = vmul.f32 0.0078125, %v1618_v57  ;;  %v1719_v42 = vunpack.c.l.bf16 %v2326_v23 }
 0x5cb   : > { %v1588_v26 = vpop.xlane.xlu0 %1587 }
 0x5cc   : > { %v1655_v27 = vmax.f32 %v1647_v44, 0.0  ;;  %v1648_v53 = vsub.f32 %v1632_v28, %v1640_v62  ;;  %v2834_v58 = vmul.f32 0.0078125, %v1588_v26  ;;  %v1720_v62 = vunpack.c.h.bf16 %v2326_v23 }
 0x5cd   : > { %v1590_v0 = vpop.xlane.xlu1 %1589 }
 0x5ce   : > { %v1671_v35 = vadd.f32 1e-05, %v1655_v27  ;;  %v1656_v4 = vmax.f32 %v1648_v53, 0.0  ;;  %v2836_v29 = vmul.f32 0.0078125, %v1590_v0  ;;  %v1641_v7 = vmul.f32 %v2834_v58, %v2834_v58 }
 0x5cf   : > { %v1620_v47 = vpop.xlane.xlu0 %1619  ;;  %v1665_v0 = vsub.f32 %v2804_v55, %v2834_v58 }
 0x5d0   : > { %2310 = vrsqrt.f32 %v1671_v35  ;;  %v1672_v30 = vadd.f32 1e-05, %v1656_v4  ;;  %v1633_v31 = vmul.f32 0.0078125, %v1620_v47  ;;  %v1642_v32 = vmul.f32 %v2836_v29, %v2836_v29 }
 0x5d1   : > { %v1622_v50 = vpop.xlane.xlu1 %1621 }
 0x5d2   : > { %2312 = vrsqrt.f32 %v1672_v30  ;;  %v1649_v34 = vsub.f32 %v1633_v31, %v1641_v7  ;;  %v1634_v37 = vmul.f32 0.0078125, %v1622_v50 }
 0x5d3   : > { %v1592_v60 = vpop.xlane.xlu0 %1591 }
 0x5d4   : > { %v1657_v63 = vmax.f32 %v1649_v34, 0.0  ;;  %v1650_v14 = vsub.f32 %v1634_v37, %v1642_v32  ;;  %v2842_v16 = vmul.f32 0.0078125, %v1592_v60  ;;  %v1666_v32 = vsub.f32 %v2806_v61, %v2836_v29 }
 0x5d5   : > { %v1594_v46 = vpop.xlane.xlu1 %1593 }
 0x5d6   : > { %v1673_v19 = vadd.f32 1e-05, %v1657_v63  ;;  %v1658_v20 = vmax.f32 %v1650_v14, 0.0  ;;  %v2846_v38 = vmul.f32 0.0078125, %v1594_v46  ;;  %v1643_v59 = vmul.f32 %v2842_v16, %v2842_v16 }
 0x5d7   : > { %v1624_v52 = vpop.xlane.xlu0 %1623 }
 0x5d8   : > { %2314 = vrsqrt.f32 %v1673_v19  ;;  %v1674_v56 = vadd.f32 1e-05, %v1658_v20  ;;  %v1635_v3 = vmul.f32 0.0078125, %v1624_v52  ;;  %v1644_v21 = vmul.f32 %v2846_v38, %v2846_v38  ;;  %v2327_v19 = vld [vmem:[%s2440_s20 + $0x8] sm:$0xff]  }
 0x5d9   : > { %v1626_v39 = vpop.xlane.xlu1 %1625  ;;  %v1721_v20 = vunpack.c.l.bf16 %v2327_v19  ;;  %v1722_v61 = vunpack.c.h.bf16 %v2327_v19 }
 0x5da   : > { %v2311_v5 = vpop.eup %2310  ;;  %2316 = vrsqrt.f32 %v1674_v56  ;;  %v1651_v6 = vsub.f32 %v1635_v3, %v1643_v59  ;;  %v1636_v41 = vmul.f32 0.0078125, %v1626_v39  ;;  %v1667_v59 = vsub.f32 %v2814_v9, %v2842_v16 }
 0x5db   : > { %v1687_v43 = vmul.f32 %v2311_v5, %v1663_v40  ;;  %v1596_v45 = vpop.xlane.xlu0 %1595  ;;  %v1668_v5 = vsub.f32 %v2816_v8, %v2846_v38 }
 0x5dc   : > { %v2313_v1 = vpop.eup %2312  ;;  %v1659_v10 = vmax.f32 %v1651_v6, 0.0  ;;  %v1652_v12 = vsub.f32 %v1636_v41, %v1644_v21  ;;  %v2860_v15 = vmul.f32 0.0078125, %v1596_v45  ;;  %v2328_v45 = vld [vmem:[%s2440_s20 + $0x10] sm:$0xff]  }
 0x5dd   : > { %v1699_v17 = vmul.f32 %v2852_v36, %v1687_v43  ;;  %v1688_v18 = vmul.f32 %v2313_v1, %v1664_v48  ;;  %v1598_v22 = vpop.xlane.xlu1 %1597  ;;  %v1723_v1 = vunpack.c.l.bf16 %v2328_v45 }
 0x5de   : > { %v1675_v25 = vadd.f32 1e-05, %v1659_v10  ;;  %v1660_v57 = vmax.f32 %v1652_v12, 0.0  ;;  %v2866_v54 = vmul.f32 0.0078125, %v1598_v22  ;;  %v1645_v26 = vmul.f32 %v2860_v15, %v2860_v15 }
 0x5df   : > { %v1711_v24 = vadd.f32 %v2858_v13, %v1699_v17  ;;  %v1700_v33 = vmul.f32 %v2852_v36, %v1688_v18  ;;  %v1628_v44 = vpop.xlane.xlu0 %1627  ;;  %v1724_v10 = vunpack.c.h.bf16 %v2328_v45  ;;  %v1669_v8 = vsub.f32 %v2824_v51, %v2860_v15 }
 0x5e0   : > { %2318 = vrsqrt.f32 %v1675_v25  ;;  %v1676_v28 = vadd.f32 1e-05, %v1660_v57  ;;  %v1637_v27 = vmul.f32 0.0078125, %v1628_v44  ;;  %v1646_v47 = vmul.f32 %v2866_v54, %v2866_v54 }
 0x5e1   : > { %v1712_v53 = vadd.f32 %v2858_v13, %v1700_v33  ;;  %v1630_v35 = vpop.xlane.xlu1 %1629  ;;  %v1727_v31 = vadd.f32 %v1719_v42, %v1711_v24  ;;  %v1670_v22 = vsub.f32 %v2826_v11, %v2866_v54  ;;  %v2329_v24 = vld [vmem:[%s2440_s20 + $0x18] sm:$0xff]  }
 0x5e2   : > { %v2315_v4 = vpop.eup %2314  ;;  %2320 = vrsqrt.f32 %v1676_v28  ;;  %v1653_v30 = vsub.f32 %v1637_v27, %v1645_v26  ;;  %v1638_v7 = vmul.f32 0.0078125, %v1630_v35  ;;  %v1725_v33 = vunpack.c.l.bf16 %v2329_v24 }
 0x5e3   : > { %v1728_v50 = vadd.f32 %v1720_v62, %v1712_v53  ;;  %v1689_v34 = vmul.f32 %v2315_v4, %v1665_v0  ;;  %v1726_v44 = vunpack.c.h.bf16 %v2329_v24 }
 0x5e4   : > { %v2317_v37 = vpop.eup %2316  ;;  %v1661_v55 = vmax.f32 %v1653_v30, 0.0  ;;  %v1654_v58 = vsub.f32 %v1638_v7, %v1646_v47 }
 0x5e5   : > { %v1993_v60 = vpack.c.bf16 %v1728_v50, %v1727_v31  ;;  %v1701_v63 = vmul.f32 %v2852_v36, %v1689_v34  ;;  %v1690_v14 = vmul.f32 %v2317_v37, %v1666_v32 }
 0x5e6   : > { %v1677_v2 = vadd.f32 1e-05, %v1661_v55  ;;  %v1662_v46 = vmax.f32 %v1654_v58, 0.0 }
 0x5e7   : > { %1994 = vst [vmem:[%s2882_s30] sm:$0xff] %v1993_v60   ;;  %v1713_v29 = vadd.f32 %v2858_v13, %v1701_v63  ;;  %v1702_v49 = vmul.f32 %v2852_v36, %v1690_v14 }
 0x5e8   : > { %2322 = vrsqrt.f32 %v1677_v2  ;;  %v1678_v52 = vadd.f32 1e-05, %v1662_v46 }
 0x5e9   : > { %v1714_v56 = vadd.f32 %v2858_v13, %v1702_v49  ;;  %v1729_v40 = vadd.f32 %v1721_v20, %v1713_v29 }
 0x5ea   : > { %v2319_v3 = vpop.eup %2318  ;;  %2324 = vrsqrt.f32 %v1678_v52 }
 0x5eb   : > { %v1730_v39 = vadd.f32 %v1722_v61, %v1714_v56  ;;  %v1691_v21 = vmul.f32 %v2319_v3, %v1667_v59 }
 0x5ec   : > { %v2321_v6 = vpop.eup %2320 }
 0x5ed   : > { %v1998_v41 = vpack.c.bf16 %v1730_v39, %v1729_v40  ;;  %v1703_v48 = vmul.f32 %v2852_v36, %v1691_v21  ;;  %v1692_v43 = vmul.f32 %v2321_v6, %v1668_v5 }
 0x5ef   : > { %2010 = vst [vmem:[%s2882_s30 + $0x8] sm:$0xff] %v1998_v41   ;;  %v1715_v9 = vadd.f32 %v2858_v13, %v1703_v48  ;;  %v1704_v16 = vmul.f32 %v2852_v36, %v1692_v43 }
 0x5f1   : > { %v1716_v12 = vadd.f32 %v2858_v13, %v1704_v16  ;;  %v1731_v17 = vadd.f32 %v1723_v1, %v1715_v9 }
 0x5f2   : > { %v2323_v38 = vpop.eup %2322 }
 0x5f3   : > { %v1732_v18 = vadd.f32 %v1724_v10, %v1716_v12  ;;  %v1693_v23 = vmul.f32 %v2323_v38, %v1669_v8 }
 0x5f4   : > { %v2325_v42 = vpop.eup %2324 }
 0x5f5   : > { %v2003_v25 = vpack.c.bf16 %v1732_v18, %v1731_v17  ;;  %v1705_v57 = vmul.f32 %v2852_v36, %v1693_v23  ;;  %v1694_v62 = vmul.f32 %v2325_v42, %v1670_v22 }
 0x5f7   : > { %2011 = vst [vmem:[%s2882_s30 + $0x10] sm:$0xff] %v2003_v25   ;;  %v1717_v28 = vadd.f32 %v2858_v13, %v1705_v57  ;;  %v1706_v51 = vmul.f32 %v2852_v36, %v1694_v62 }
 0x5f9   : > { %v1718_v15 = vadd.f32 %v2858_v13, %v1706_v51  ;;  %v1733_v26 = vadd.f32 %v1725_v33, %v1717_v28 }
 0x5fb   : > { %v1734_v27 = vadd.f32 %v1726_v44, %v1718_v15 }
 0x5fd   : > { %v2008_v11 = vpack.c.bf16 %v1734_v27, %v1733_v26 }
 0x5ff   : > { %2012 = vst [vmem:[%s2882_s30 + $0x18] sm:$0xff] %v2008_v11  }
 0x600 PF: > { %s17_s26 = sadd.s32 1, %s2352_s26   ;;  %s2928_s24 = smov %s2348_s25 }
 0x601   : > { %p14_p5 = scmp.ge.s32.totalorder %s17_s26, 4   ;;  %s2929_s25 = smov %s2931_s27 }
 0x603   :  { %16 = sbr.rel (!%p14_p5) target bundleno = 2 (0x2), region = 81 }

</bundles_post_ra>
